<compile_context>
chip_gen: v7x
topology: tpu7x:2x2x1
jax: 0.10.0
libtpu: 0.0.40
codegen_flags: <defaults>
</compile_context>

<pallas_src>
import functools

import numpy as np

import jax
import jax.numpy as jnp
from jax.experimental import pallas as pl
from jax.experimental.pallas import tpu as pltpu


# ---------------- embedder config (get_embedder(5)) ----------------
MULTIRES = 5
MAX_FREQ = MULTIRES - 1
# log_sampling: 2 ** linspace(0, max_freq, num_freqs)  ->  [1, 2, 4, 8, 16]
FREQS = tuple(2.0 ** (MAX_FREQ * i / (MULTIRES - 1)) for i in range(MULTIRES))
IN_DIMS = 3
FREQ_DIM = IN_DIMS * MULTIRES               # 15
EMBED_DIM = IN_DIMS * (1 + 2 * MULTIRES)    # 33

HIDDEN = 16        # hidden_unit = [16]
OUT_CH = 8         # out_channel for the example
BN_EPS = 1e-5


# ---------------- Pallas kernel ----------------
def scorenet_kernel(x_ref, rmat_ref, w1x_ref, w1s_ref, w1c_ref, sh1_ref,
                    w2_ref, b2_ref, o_ref, *, bias):
    x = x_ref[0]                                                          # (3, TL)

    # Positional embedding, restructured: xf[3*f + c] = FREQS[f] * x[c].
    # One MXU op + one sin + one cos (instead of 5 sin + 5 cos + 11-piece concat).
    xf = jnp.dot(rmat_ref[...], x, preferred_element_type=jnp.float32)    # (15, TL)
    sin_xf = jnp.sin(xf)
    cos_xf = jnp.cos(xf)

    # Hidden layer: relu(bn(conv1(emb))).  conv1 split into 3 aligned matmuls,
    # BN scale already folded into the weights, only the shift remains.
    h = (jnp.dot(w1x_ref[...], x, preferred_element_type=jnp.float32)
         + jnp.dot(w1s_ref[...], sin_xf, preferred_element_type=jnp.float32)
         + jnp.dot(w1c_ref[...], cos_xf, preferred_element_type=jnp.float32)
         + sh1_ref[...])                                                  # (16, TL)
    h = jnp.maximum(h, 0.0)

    # Last layer: conv2 (1x1 conv with bias, no BN since last_bn=False).
    logits = (jnp.dot(w2_ref[...], h, preferred_element_type=jnp.float32)
              + b2_ref[...])                                              # (8, TL)

    # Softmax over the channel (sublane) axis, + bias.  Single reciprocal of the
    # (1, TL) denominator instead of an (8, TL) divide.
    m = jnp.max(logits, axis=0, keepdims=True)                            # (1, TL)
    e = jnp.exp(logits - m)                                               # (8, TL)
    s = jnp.sum(e, axis=0, keepdims=True)                                 # (1, TL)
    o_ref[0] = e * pl.reciprocal(s, approx=False) + bias


# ---------------- wrapper ----------------
def _round_up(x, m):
    return (x + m - 1) // m * m


def scorenet_forward(xyz, params, *, bias=0.0, tl=2048):
    """xyz: (B, 3, N, K) float32  ->  scores: (B, N, K, OUT_CH) float32."""
    B, C, N, K = xyz.shape
    assert C == IN_DIMS
    NK = N * K
    x = xyz.reshape(B, C, NK).astype(jnp.float32)      # free NCHW reshape, no transpose

    # lane-tile size: multiple of 128, clamped to the (padded) point count
    tl = max(128, _round_up(tl, 128))
    tl = min(tl, _round_up(NK, 128))
    NK_pad = _round_up(NK, tl)
    if NK_pad != NK:
        x = jnp.pad(x, ((0, 0), (0, 0), (0, NK_pad - NK)))

    rmat, w1x, w1s, w1c, shift1, w2, b2 = pack_kernel_params(params)
    grid = (B, NK_pad // tl)

    out = pl.pallas_call(
        functools.partial(scorenet_kernel, bias=float(bias)),
        out_shape=jax.ShapeDtypeStruct((B, OUT_CH, NK_pad), jnp.float32),
        grid=grid,
        in_specs=[
            pl.BlockSpec((1, IN_DIMS, tl), lambda b, j: (b, 0, j)),   # x
            pl.BlockSpec((FREQ_DIM, IN_DIMS), lambda b, j: (0, 0)),   # R (15, 3)
            pl.BlockSpec((HIDDEN, IN_DIMS), lambda b, j: (0, 0)),     # W1_x
            pl.BlockSpec((HIDDEN, FREQ_DIM), lambda b, j: (0, 0)),    # W1_sin
            pl.BlockSpec((HIDDEN, FREQ_DIM), lambda b, j: (0, 0)),    # W1_cos
            pl.BlockSpec((HIDDEN, 1), lambda b, j: (0, 0)),           # folded BN shift
            pl.BlockSpec((OUT_CH, HIDDEN), lambda b, j: (0, 0)),      # W2
            pl.BlockSpec((OUT_CH, 1), lambda b, j: (0, 0)),           # b2
        ],
        out_specs=pl.BlockSpec((1, OUT_CH, tl), lambda b, j: (b, 0, j)),
        compiler_params=pltpu.CompilerParams(
            dimension_semantics=("parallel", "parallel")),
    )(x, rmat, w1x, w1s, w1c, shift1, w2, b2)

    out = out[:, :, :NK]                                # (B, 8, N*K)
    # == torch's scores.permute(0, 2, 3, 1)
    return jnp.transpose(out, (0, 2, 1)).reshape(B, N, K, OUT_CH)


# ---------------- deterministic parameter construction (torch layout) ----------------
def make_params(key):
    k1, k2, k3, k4, k5, k6, k7 = jax.random.split(key, 7)
    # conv1: Conv2d(33, 16, 1, bias=False) -> weight (16, 33, 1, 1); stored (16, 33)
    w1 = jax.random.normal(k1, (HIDDEN, EMBED_DIM), jnp.float32) * 0.1
    # BatchNorm2d(16) eval-mode params
    gamma = 1.0 + 0.1 * jax.random.normal(k2, (HIDDEN,), jnp.float32)
    beta = 0.1 * jax.random.normal(k3, (HIDDEN,), jnp.float32)
    run_mean = 0.05 * jax.random.normal(k4, (HIDDEN,), jnp.float32)
    run_var = jnp.abs(1.0 + 0.1 * jax.random.normal(k5, (HIDDEN,), jnp.float32))
    # conv2: Conv2d(16, OUT_CH, 1, bias=True) -> weight (OUT_CH, 16, 1, 1); stored (8, 16)
    w2 = jax.random.normal(k6, (OUT_CH, HIDDEN), jnp.float32) * 0.1
    b2 = 0.1 * jax.random.normal(k7, (OUT_CH,), jnp.float32)
    return dict(w1=w1, gamma=gamma, beta=beta, mean=run_mean, var=run_var,
                w2=w2, b2=b2)


def pack_kernel_params(p):
    """Fold BN (eval mode) into conv1 and split W1 by embedder channel group."""
    scale1 = p["gamma"] / jnp.sqrt(p["var"] + BN_EPS)
    shift1 = p["beta"] - p["mean"] * scale1
    w1 = p["w1"] * scale1[:, None]                      # fold BN scale into conv1 weight
    # torch embedder channel order: [x(3), sin f0(3), cos f0(3), sin f1(3), cos f1(3), ...]
    sin_idx = np.array([3 + 6 * f + c for f in range(MULTIRES) for c in range(IN_DIMS)])
    cos_idx = sin_idx + IN_DIMS
    w1x = w1[:, :IN_DIMS]                               # (16, 3)
    w1s = w1[:, sin_idx]                                # (16, 15), freq-major / channel-minor
    w1c = w1[:, cos_idx]                                # (16, 15)
    # frequency-replication matrix: (R @ x)[3*f + c] = FREQS[f] * x[c]
    rmat = np.zeros((FREQ_DIM, IN_DIMS), np.float32)
    for f, fr in enumerate(FREQS):
        for c in range(IN_DIMS):
            rmat[f * IN_DIMS + c, c] = fr
    return (jnp.asarray(rmat), w1x, w1s, w1c,
            shift1[:, None], p["w2"], p["b2"][:, None])


# ---------------- pure-JAX reference (mirrors the torch forward) ----------------
def _embed(x):
    """x: (..., 3) -> (..., 33), same channel ordering as torch Embedder."""
    parts = [x]
    for f in FREQS:
        parts.append(jnp.sin(x * f))
        parts.append(jnp.cos(x * f))
    return jnp.concatenate(parts, axis=-1)


def scorenet_reference(xyz, p, *, bias=0.0):
    scale1 = p["gamma"] / jnp.sqrt(p["var"] + BN_EPS)
    shift1 = p["beta"] - p["mean"] * scale1
    x = jnp.transpose(xyz, (0, 2, 3, 1)).astype(jnp.float32)   # (B, N, K, 3)
    emb = _embed(x)                                            # (B, N, K, 33)
    h = jnp.maximum(emb @ p["w1"].T * scale1 + shift1, 0.0)    # (B, N, K, 16)
    logits = h @ p["w2"].T + p["b2"]                           # (B, N, K, 8)
    # softmax over torch dim=1 followed by permute(0,2,3,1) == softmax over last dim here
    return jax.nn.softmax(logits, axis=-1) + bias


if __name__ == "__main__":
    key = jax.random.PRNGKey(0)
    kx, kp = jax.random.split(key)

    B, N, K = 2, 64, 16
    xyz = jax.random.normal(kx, (B, IN_DIMS, N, K), jnp.float32)   # torch-style NCHW input
    params = make_params(kp)

    # tl=512 -> grid (B, 2): exercises multi-step tiling while staying lane-dense
    out = scorenet_forward(xyz, params, bias=0.0, tl=512)
    out = jax.block_until_ready(out)

    ref = scorenet_reference(xyz, params, bias=0.0)
    assert out.shape == (B, N, K, OUT_CH)
    assert jnp.allclose(out, ref, atol=2e-5, rtol=2e-5), "mismatch vs reference"

    print("KERNEL_OK")
</pallas_src>

<mosaic_0001>
module attributes {stable_mosaic.version = 11 : i64} {
  func.func @scorenet_kernel(%arg0: i32, %arg1: i32, %arg2: memref<1x3x512xf32, #tpu.memory_space<vmem>>, %arg3: memref<15x3xf32, #tpu.memory_space<vmem>>, %arg4: memref<16x3xf32, #tpu.memory_space<vmem>>, %arg5: memref<16x15xf32, #tpu.memory_space<vmem>>, %arg6: memref<16x15xf32, #tpu.memory_space<vmem>>, %arg7: memref<16x1xf32, #tpu.memory_space<vmem>>, %arg8: memref<8x16xf32, #tpu.memory_space<vmem>>, %arg9: memref<8x1xf32, #tpu.memory_space<vmem>>, %arg10: memref<1x8x512xf32, #tpu.memory_space<vmem>>) attributes {dimension_semantics = [#tpu.dimension_semantics<parallel>, #tpu.dimension_semantics<parallel>], iteration_bounds = array<i64: 2, 2>, scalar_prefetch = 0 : i64, scratch_operands = 0 : i64, tpu.core_type = #tpu.core_type<tc>, window_params = [{transform_indices = @transform_0, window_bounds = array<i64: 1, 3, 512>}, {pipeline_mode = #tpu.pipeline_mode<synchronous>, transform_indices = @transform_1, window_bounds = array<i64: 15, 3>}, {pipeline_mode = #tpu.pipeline_mode<synchronous>, transform_indices = @transform_2, window_bounds = array<i64: 16, 3>}, {pipeline_mode = #tpu.pipeline_mode<synchronous>, transform_indices = @transform_3, window_bounds = array<i64: 16, 15>}, {pipeline_mode = #tpu.pipeline_mode<synchronous>, transform_indices = @transform_4, window_bounds = array<i64: 16, 15>}, {pipeline_mode = #tpu.pipeline_mode<synchronous>, transform_indices = @transform_5, window_bounds = array<i64: 16, 1>}, {pipeline_mode = #tpu.pipeline_mode<synchronous>, transform_indices = @transform_6, window_bounds = array<i64: 8, 16>}, {pipeline_mode = #tpu.pipeline_mode<synchronous>, transform_indices = @transform_7, window_bounds = array<i64: 8, 1>}, {transform_indices = @transform_8, window_bounds = array<i64: 1, 8, 512>}]} {
    %c0 = arith.constant 0 : index
    %c0_0 = arith.constant 0 : index
    %c0_1 = arith.constant 0 : index
    %0 = vector.load %arg2[%c0, %c0_0, %c0_1] : memref<1x3x512xf32, #tpu.memory_space<vmem>>, vector<1x3x512xf32>
    %1 = vector.shape_cast %0 : vector<1x3x512xf32> to vector<3x512xf32>
    %c0_2 = arith.constant 0 : index
    %c0_3 = arith.constant 0 : index
    %2 = vector.load %arg3[%c0_2, %c0_3] : memref<15x3xf32, #tpu.memory_space<vmem>>, vector<15x3xf32>
    %cst = arith.constant dense<0.000000e+00> : vector<15x512xf32>
    %3 = tpu.matmul %2, %1, %cst {dimension_numbers = #tpu.dot_dimension_numbers<[1], [0], [0], [1], [0, 0, 1, 1], [], []>} : vector<15x3xf32>, vector<3x512xf32>, vector<15x512xf32> -> vector<15x512xf32>
    %4 = math.sin %3 : vector<15x512xf32>
    %5 = math.cos %3 : vector<15x512xf32>
    %c0_4 = arith.constant 0 : index
    %c0_5 = arith.constant 0 : index
    %6 = vector.load %arg4[%c0_4, %c0_5] : memref<16x3xf32, #tpu.memory_space<vmem>>, vector<16x3xf32>
    %cst_6 = arith.constant dense<0.000000e+00> : vector<16x512xf32>
    %7 = tpu.matmul %6, %1, %cst_6 {dimension_numbers = #tpu.dot_dimension_numbers<[1], [0], [0], [1], [0, 0, 1, 1], [], []>} : vector<16x3xf32>, vector<3x512xf32>, vector<16x512xf32> -> vector<16x512xf32>
    %c0_7 = arith.constant 0 : index
    %c0_8 = arith.constant 0 : index
    %8 = vector.load %arg5[%c0_7, %c0_8] : memref<16x15xf32, #tpu.memory_space<vmem>>, vector<16x15xf32>
    %cst_9 = arith.constant dense<0.000000e+00> : vector<16x512xf32>
    %9 = tpu.matmul %8, %4, %cst_9 {dimension_numbers = #tpu.dot_dimension_numbers<[1], [0], [0], [1], [0, 0, 1, 1], [], []>} : vector<16x15xf32>, vector<15x512xf32>, vector<16x512xf32> -> vector<16x512xf32>
    %10 = arith.addf %7, %9 : vector<16x512xf32>
    %c0_10 = arith.constant 0 : index
    %c0_11 = arith.constant 0 : index
    %11 = vector.load %arg6[%c0_10, %c0_11] : memref<16x15xf32, #tpu.memory_space<vmem>>, vector<16x15xf32>
    %cst_12 = arith.constant dense<0.000000e+00> : vector<16x512xf32>
    %12 = tpu.matmul %11, %5, %cst_12 {dimension_numbers = #tpu.dot_dimension_numbers<[1], [0], [0], [1], [0, 0, 1, 1], [], []>} : vector<16x15xf32>, vector<15x512xf32>, vector<16x512xf32> -> vector<16x512xf32>
    %13 = arith.addf %10, %12 : vector<16x512xf32>
    %c0_13 = arith.constant 0 : index
    %c0_14 = arith.constant 0 : index
    %14 = vector.load %arg7[%c0_13, %c0_14] : memref<16x1xf32, #tpu.memory_space<vmem>>, vector<16x1xf32>
    %15 = vector.broadcast %14 : vector<16x1xf32> to vector<16x512xf32>
    %16 = arith.addf %13, %15 : vector<16x512xf32>
    %cst_15 = arith.constant 0.000000e+00 : f32
    %17 = vector.broadcast %cst_15 : f32 to vector<16x512xf32>
    %18 = arith.maximumf %16, %17 : vector<16x512xf32>
    %c0_16 = arith.constant 0 : index
    %c0_17 = arith.constant 0 : index
    %19 = vector.load %arg8[%c0_16, %c0_17] : memref<8x16xf32, #tpu.memory_space<vmem>>, vector<8x16xf32>
    %cst_18 = arith.constant dense<0.000000e+00> : vector<8x512xf32>
    %20 = tpu.matmul %19, %18, %cst_18 {dimension_numbers = #tpu.dot_dimension_numbers<[1], [0], [0], [1], [0, 0, 1, 1], [], []>} : vector<8x16xf32>, vector<16x512xf32>, vector<8x512xf32> -> vector<8x512xf32>
    %c0_19 = arith.constant 0 : index
    %c0_20 = arith.constant 0 : index
    %21 = vector.load %arg9[%c0_19, %c0_20] : memref<8x1xf32, #tpu.memory_space<vmem>>, vector<8x1xf32>
    %22 = vector.broadcast %21 : vector<8x1xf32> to vector<8x512xf32>
    %23 = arith.addf %20, %22 : vector<8x512xf32>
    %cst_21 = arith.constant dense<0xFF800000> : vector<512xf32>
    %24 = vector.multi_reduction <maximumf>, %23, %cst_21 [0] : vector<8x512xf32> to vector<512xf32>
    %25 = vector.shape_cast %24 : vector<512xf32> to vector<1x512xf32>
    %26 = vector.broadcast %25 : vector<1x512xf32> to vector<8x512xf32>
    %27 = arith.subf %23, %26 : vector<8x512xf32>
    %28 = math.exp %27 : vector<8x512xf32>
    %cst_22 = arith.constant dense<0.000000e+00> : vector<512xf32>
    %29 = vector.multi_reduction <add>, %28, %cst_22 [0] : vector<8x512xf32> to vector<512xf32>
    %30 = vector.shape_cast %29 : vector<512xf32> to vector<1x512xf32>
    %31 = tpu.reciprocal %30 : vector<1x512xf32> -> vector<1x512xf32>
    %32 = vector.broadcast %31 : vector<1x512xf32> to vector<8x512xf32>
    %33 = arith.mulf %28, %32 : vector<8x512xf32>
    %cst_23 = arith.constant 0.000000e+00 : f32
    %34 = vector.broadcast %cst_23 : f32 to vector<8x512xf32>
    %35 = arith.addf %33, %34 : vector<8x512xf32>
    %c0_24 = arith.constant 0 : index
    %c0_25 = arith.constant 0 : index
    %c0_26 = arith.constant 0 : index
    %36 = vector.load %arg10[%c0_24, %c0_25, %c0_26] : memref<1x8x512xf32, #tpu.memory_space<vmem>>, vector<1x8x512xf32>
    %37 = vector.shape_cast %36 : vector<1x8x512xf32> to vector<8x512xf32>
    %38 = vector.shape_cast %35 : vector<8x512xf32> to vector<1x8x512xf32>
    tpu.vector_store %arg10[%c0_24, %c0_25, %c0_26], %38 {strides = array<i32>} : memref<1x8x512xf32, #tpu.memory_space<vmem>>, vector<1x8x512xf32>,
    return
  }
  func.func @transform_0(%arg0: i32, %arg1: i32) -> (i32, i32, i32) {
    %c0_i32 = arith.constant 0 : i32
    %c0_i32_0 = arith.constant 0 : i32
    return %arg0, %c0_i32, %arg1 : i32, i32, i32
  }
  func.func @transform_1(%arg0: i32, %arg1: i32) -> (i32, i32) {
    %c0_i32 = arith.constant 0 : i32
    %c0_i32_0 = arith.constant 0 : i32
    %c0_i32_1 = arith.constant 0 : i32
    return %c0_i32, %c0_i32_0 : i32, i32
  }
  func.func @transform_2(%arg0: i32, %arg1: i32) -> (i32, i32) {
    %c0_i32 = arith.constant 0 : i32
    %c0_i32_0 = arith.constant 0 : i32
    %c0_i32_1 = arith.constant 0 : i32
    return %c0_i32, %c0_i32_0 : i32, i32
  }
  func.func @transform_3(%arg0: i32, %arg1: i32) -> (i32, i32) {
    %c0_i32 = arith.constant 0 : i32
    %c0_i32_0 = arith.constant 0 : i32
    %c0_i32_1 = arith.constant 0 : i32
    return %c0_i32, %c0_i32_0 : i32, i32
  }
  func.func @transform_4(%arg0: i32, %arg1: i32) -> (i32, i32) {
    %c0_i32 = arith.constant 0 : i32
    %c0_i32_0 = arith.constant 0 : i32
    %c0_i32_1 = arith.constant 0 : i32
    return %c0_i32, %c0_i32_0 : i32, i32
  }
  func.func @transform_5(%arg0: i32, %arg1: i32) -> (i32, i32) {
    %c0_i32 = arith.constant 0 : i32
    %c0_i32_0 = arith.constant 0 : i32
    %c0_i32_1 = arith.constant 0 : i32
    return %c0_i32, %c0_i32_0 : i32, i32
  }
  func.func @transform_6(%arg0: i32, %arg1: i32) -> (i32, i32) {
    %c0_i32 = arith.constant 0 : i32
    %c0_i32_0 = arith.constant 0 : i32
    %c0_i32_1 = arith.constant 0 : i32
    return %c0_i32, %c0_i32_0 : i32, i32
  }
  func.func @transform_7(%arg0: i32, %arg1: i32) -> (i32, i32) {
    %c0_i32 = arith.constant 0 : i32
    %c0_i32_0 = arith.constant 0 : i32
    %c0_i32_1 = arith.constant 0 : i32
    return %c0_i32, %c0_i32_0 : i32, i32
  }
  func.func @transform_8(%arg0: i32, %arg1: i32) -> (i32, i32, i32) {
    %c0_i32 = arith.constant 0 : i32
    %c0_i32_0 = arith.constant 0 : i32
    return %arg0, %c0_i32, %arg1 : i32, i32, i32
  }
}

</mosaic_0001>

<bundles_post_ra>
// kernel: tpu_custom_call.1
= control target key start
LH: loop header
LB: loop body
LE: loop exit
PB: predicated region body
PF: predicated region fallthrough
CT: control target
= control target key end

     0   :  { %13 = vsyncpa [#allocation3], 0  ;;  %s4569_s0 = inlined_call_operand.vmem [shape: f32[2,3,1024], index: 0, kind: input, shape index: {}]   ;;  %s4570_s1 = inlined_call_operand.vmem [shape: f32[15,3], index: 1, kind: input, shape index: {}]   ;;  %s4571_s2 = inlined_call_operand.vmem [shape: f32[16,3], index: 2, kind: input, shape index: {}]   ;;  %s4572_s3 = inlined_call_operand.vmem [shape: f32[16,15], index: 3, kind: input, shape index: {}]   ;;  %s4573_s4 = inlined_call_operand.vmem [shape: f32[16,15], index: 4, kind: input, shape index: {}]   ;;  %s4574_s5 = inlined_call_operand.vmem [shape: f32[16,1], index: 5, kind: input, shape index: {}]   ;;  %s4575_s6 = inlined_call_operand.vmem [shape: f32[8,16], index: 6, kind: input, shape index: {}]   ;;  %s4576_s7 = inlined_call_operand.vmem [shape: f32[8,1], index: 7, kind: input, shape index: {}]   ;;  %s4577_s8 = inlined_call_operand.hbm [shape: f32[2,8,1024], index: 8, kind: output, shape index: {}]  }
   0x1   :  { %15 = vsyncpa [#allocation3 + $0x1], 0  ;;  %s3520_s27 = smov 0   ;;  %s3522_s28 = smov 0  }
   0x2   :  { %s3524_s29 = smov 0   ;;  %s3526_s30 = smov 0  }
   0x3   :  { %s3528_s9 = smov 0   ;;  %s3530_s10 = smov 0  }
   0x4   :  { %s3532_s11 = smov 0   ;;  %s3534_s12 = smov 0  }
   0x5 LB: > { %s3042_s13 = sadd.s32 4294967295, %s3463_s12   ;;  %s3043_s14 = sadd.s32 4294967294, %s3463_s12   ;;  %s3463_s12 = sphi %s3534_s12, %s21_s12   ;;  %s3459_s11 = sphi %s3532_s11, %s4606_s11   ;;  %s3455_s10 = sphi %s3530_s10, %s4605_s10   ;;  %s3451_s9 = sphi %s3528_s9, %s4604_s9   ;;  %s3447_s30 = sphi %s3526_s30, %s4603_s30   ;;  %s3443_s29 = sphi %s3524_s29, %s4602_s29   ;;  %s3439_s28 = sphi %s3522_s28, %s4601_s28   ;;  %s3435_s27 = sphi %s3520_s27, %s4600_s27  }
   0x6   : > { %s30_s15 = sadd.s32 1, %s3455_s10  ;;  %s33_s16 = sadd.s32 1, %s3459_s11 }
   0x7   : > { %p31_p0 = scmp.ge.s32.totalorder %s30_s15, 2  ;;  %p227_p1 = scmp.ne.s32.totalorder %s3443_s29, %s3439_s28 }
   0x8   : > { %p228_p2 = scmp.eq.s32.totalorder %s3042_s13, 3  ;;  %p233_p5 = scmp.ne.s32.totalorder %s3439_s28, %s3435_s27 }
   0x9   : > { %s4608_s15 = smov (%p31_p0, %s30_s15), 0  ;;  %s4610_s16 = smov (!%p31_p0, %s33_s16), %s3459_s11 }
   0xa   : > { %s213_s17 = ssub.s32 %s3455_s10, %s4608_s15  ;;  %p3571_p3 = por %p228_p2, %p227_p1 }
   0xb   : > { %p35_p4 = scmp.ge.s32.totalorder %s4610_s16, 2  ;;  %p234_p6 = scmp.eq.s32.totalorder %s3043_s14, 3 }
   0xc   : > { %p3046_p7 = scmp.ge.s32.totalorder %s3463_s12, 1  ;;  %p286_p9 = scmp.lt.s32.totalorder %s3463_s12, 5 }
   0xd   : > { %s4612_s16 = smov (%p35_p4, %s4610_s16), 0  ;;  %p3580_p8 = por %p234_p6, %p233_p5 }
   0xe   : > { %4582 = sst [smem:[#allocation5_spill]] %s4612_s16  ;;  %s212_s20 = ssub.s32 %s3459_s11, %s4612_s16 }
   0xf   : > { %s217_s21 = sadd.s32 1, %s3443_s29  ;;  %s214_s22 = sor.u32 %s213_s17, %s212_s20 }
  0x10   : > { %p287_p10 = pnand %p3046_p7, %p286_p9  ;;  %p215_p11 = scmp.eq.s32.totalorder %s214_s22, 0 }
  0x11   : > { %s3592_s24 = sshll.u32 (!%p287_p10), %s3447_s30, 2  ;;  %p325_p12 = scmp.lt.s32.totalorder (!%p287_p10), %s3451_s9, 1  ;;  %v4579_v0 = vmov (!%p287_p10), 0.0   ;;  %vm350_vm0 = vcmask (!%p287_p10), 1042432   ;;  %v337_v5 = vld [vmem:[%s4570_s1] sm:$0xff] (!%p287_p10)  ;;  %vm343_vm1 = vcmask (!%p287_p10), 23552  }
  0x12   : > { %s3589_s23 = scalar_select %p215_p11, %s3443_s29, %s217_s21  }
  0x13   : > { %290 = sbr.rel (%p287_p10) target bundleno = 1015 (0x3f7), region = 52  ;;  %p327_p13 = scmp.lt.s32.totalorder (!%p287_p10), %s3592_s24, 7  ;;  %423 = vmatprep.mubr.f32.mxu0 (!%p287_p10), %v4579_v0  ;;  %500 = vmatprep.mubr.f32.mxu1 (!%p287_p10), %v4579_v0  ;;  %v338_v6 = vld [vmem:[%s4570_s1 + $0x8] sm:$0x7f] (!%p287_p10)  ;;  %v3466_v40 = vmov (!%p287_p10), 683565275  }
  0x14   : > { %v3467_v44 = vmov (!%p287_p10), 2475754826   ;;  %v3468_v46 = vmov (!%p287_p10), 2131351028   ;;  %v3469_v48 = vmov (!%p287_p10), 2102212464  }
  0x15   : > { %v3470_v50 = vmov (!%p287_p10), 920167782   ;;  %v3471_v57 = vmov (!%p287_p10), 1326507024   ;;  %s3151_s20 = sshll.u32 (!%p287_p10), %s3451_s9, 3 }
  0x16   : > { %s2959_s21 = sadd.s32 (!%p287_p10), %s3151_s20, %s3592_s24 }
  0x17   : > { %s3152_s30 = sshll.u32 (!%p287_p10), %s2959_s21, 7 }
  0x1a   : > { %s326_s25 = scalar_select %p325_p12, %s3451_s9, 1 }
  0x1b   : > { %s328_s26 = scalar_select %p327_p13, %s3592_s24, 7 }
  0x1c   : > { %s3049_s13 = sshll.u32 %s326_s25, 3 }
  0x1d   : > { %s330_s14 = sadd.s32 %s3049_s13, %s328_s26  ;;  %s321_s13 = sand.u32 1, %s3439_s28  }
  0x1e   : > { %s3050_s17 = sshll.u32 %s330_s14, 2  ;;  %s3047_s14 = sshll.u32 %s321_s13, 5 }
  0x1f   : > { %s3603_s22 = scalar_lea.vmem %s4569_s0, %s3050_s17  ;;  %s323_s17 = scalar_lea.vmem [#allocation2], %s3047_s14 }
  0x20   : > { %v335_v1 = vld [vmem:[%s3603_s22] sm:$0x77]  ;;  %v336_v2 = vld [vmem:[%s3603_s22 + $0x8] sm:$0x77]  ;;  %s4514_s26 = scalar_lea.hbm %s4577_s8, %s3152_s30  ;;  %s2947_s9 = scalar_lea.sflag [#allocation3], %s321_s13 }
  0x21   : > { %v3607_v3 = vcombine.high %v335_v1, %v335_v1  ;;  %v3609_v4 = vcombine.high %v336_v2, %v336_v2  ;;  %s3474_s14 = smov [#allocation2]  }
  0x22   : > { %s3373_s20 = sshll.u32 %s3474_s14, 4  ;;  %s3374_s20 = int_to_ptr.vmem [resolvable:$false] %s3373_s20 }
  0x23   : > { %3051 = vmatprep.subr.msk.mxu0 %vm350_vm0, %v3607_v3  ;;  %3055 = vmatprep.subr.msk.mxu1 %vm350_vm0, %v3609_v4  ;;  %s3375_s21 = scalar_lea.vmem %s3374_s20, 1024 }
  0x24   : > { %3052 = vmatpush1.msk.msra.mxu0 %vm350_vm0, %v335_v1  ;;  %3056 = vmatpush1.msk.msra.mxu1 %vm350_vm0, %v336_v2 }
  0x25   : > { %3053 = vmatmul.mubr.msk.f32.vlgmr.msra.gmra.mrb[0].mxu0 %vm343_vm1, %v337_v5  ;;  %3057 = vmatmul.mubr.msk.f32.vlgmr.msra.gmra.mrb[0].mxu1 %vm343_vm1, %v337_v5 }
  0x26   : > { %429 = vmatprep.mubr.f32.mxu0 %v4579_v0  ;;  %506 = vmatprep.mubr.f32.mxu1 %v4579_v0 }
  0x29   : > { %3054 = vmatmul.mubr.msk.f32.gmra.mrb[2].mxu0 %vm343_vm1, %v338_v6  ;;  %3058 = vmatmul.mubr.msk.f32.gmra.mrb[2].mxu1 %vm343_vm1, %v338_v6 }
  0x2a   : > { %2257 = vmatprep.mubr.f32.mxu0 %v4579_v0  ;;  %2334 = vmatprep.mubr.f32.mxu1 %v4579_v0 }
  0xf8   : > { %v3631_v7 = vpop.f32.mrb[0].mxu0  ;;  %v3633_v8 = vpop.f32.mrb[0].mxu1 }
  0xf9   : > { %v513_v9 = vand.u32 2147483647, %v3631_v7  ;;  %v516_v10 = vand.u32 2139095040, %v3631_v7  ;;  %v3637_v11 = vpop.f32.mrb[1].mxu0  ;;  %v3639_v12 = vpop.f32.mrb[1].mxu1  ;;  %v724_v14 = vand.u32 2139095040, %v3633_v8 }
  0xfa   : > { %v721_v13 = vand.u32 2147483647, %v3633_v8  ;;  %v620_v19 = vand.u32 2139095040, %v3637_v11 }
  0xfb   : > { %v517_v15 = vshrl.u32 %v516_v10, 23  ;;  %v520_v16 = vand.u32 8388607, %v513_v9  ;;  %v725_v17 = vshrl.u32 %v724_v14, 23 }
  0xfc   : > { %v728_v18 = vand.u32 8388607, %v721_v13  ;;  %v3648_v21 = vpop.f32.mrb[2].mxu0  ;;  %v3650_v22 = vpop.f32.mrb[2].mxu1  ;;  %v621_v24 = vshrl.u32 %v620_v19, 23 }
  0xfd   : > { %v3059_v20 = vadd.s32 4294967169, %v517_v15  ;;  %v3067_v23 = vadd.s32 4294967169, %v725_v17  ;;  %v3652_v25 = vpop.f32.mrb[3].mxu0  ;;  %v521_v27 = vor.u32 8388608, %v520_v16  ;;  %v3654_v31 = vpop.f32.mrb[3].mxu1 }
  0xfe   : > { %v729_v28 = vor.u32 8388608, %v728_v18  ;;  %v3063_v30 = vadd.s32 4294967169, %v621_v24 }
  0xff   : > { %v523_v26 = vadd.s32 1, %v3059_v20  ;;  %v731_v29 = vadd.s32 1, %v3067_v23  ;;  %v3656_v36 = vshll.u32 %v521_v27, 8 }
 0x100   : > { %v3658_v37 = vshll.u32 %v729_v28, 8  ;;  %v3660_v38 = vadd.s32 1, %v3063_v30 }
 0x101   : > { %vm524_vm2 = vcmp.gt.s32.totalorder %v523_v26, 0  ;;  %vm732_vm3 = vcmp.gt.s32.totalorder %v731_v29, 0 }
 0x102   : > { %v525_v32 = vsel %vm524_vm2, %v523_v26, 0  ;;  %v733_v35 = vsel %vm732_vm3, %v731_v29, 0  ;;  %vm628_vm8 = vcmp.gt.s32.totalorder %v3660_v38, 0 }
 0x103   : > { %v526_v33 = vshrl.u32 %v525_v32, 5  ;;  %v527_v34 = vand.u32 31, %v525_v32  ;;  %v3663_v42 = vshrl.u32 %v733_v35, 5  ;;  %v735_v43 = vand.u32 31, %v733_v35 }
 0x105   : > { %v528_v39 = vsub.s32 32, %v527_v34  ;;  %v530_v41 = vshll.u32 %v3466_v40, %v527_v34  ;;  %v533_v45 = vshll.u32 %v3467_v44, %v527_v34  ;;  %v536_v47 = vshll.u32 %v3468_v46, %v527_v34 }
 0x106   : > { %v539_v49 = vshll.u32 %v3469_v48, %v527_v34  ;;  %v542_v51 = vshll.u32 %v3470_v50, %v527_v34  ;;  %vm545_vm4 = vcmp.lt.s32.totalorder %v526_v33, 1  ;;  %vm546_vm5 = vcmp.lt.s32.totalorder %v526_v33, 2 }
 0x107   : > { %v531_v52 = vshrl.u32 %v3467_v44, %v528_v39  ;;  %v534_v53 = vshrl.u32 %v3468_v46, %v528_v39  ;;  %v537_v54 = vshrl.u32 %v3469_v48, %v528_v39  ;;  %v529_v55 = vshrl.u32 %v3466_v40, %v528_v39 }
 0x108   : > { %v540_v56 = vshrl.u32 %v3470_v50, %v528_v39  ;;  %v543_v58 = vshrl.u32 %v3471_v57, %v528_v39  ;;  %v736_v62 = vsub.s32 32, %v735_v43  ;;  %vm547_vm6 = vcmp.lt.s32.totalorder %v526_v33, 3 }
 0x109   : > { %v532_v59 = vor.u32 %v531_v52, %v530_v41  ;;  %v535_v60 = vor.u32 %v534_v53, %v533_v45  ;;  %v538_v61 = vor.u32 %v537_v54, %v536_v47  ;;  %vm548_vm7 = vcmp.lt.s32.totalorder %v526_v33, 4 }
 0x10a   : > { %v541_v63 = vor.u32 %v540_v56, %v539_v49  ;;  %v544_v1 = vor.u32 %v543_v58, %v542_v51  ;;  %v738_v17 = vshll.u32 %v3466_v40, %v735_v43  ;;  %v739_v20 = vshrl.u32 %v3467_v44, %v736_v62 }
 0x10b   : > { %v549_v2 = vsel %vm545_vm4, %v529_v55, %v532_v59  ;;  %v550_v5 = vsel %vm548_vm7, %v538_v61, 2102212464  ;;  %v553_v6 = vsel %vm545_vm4, %v532_v59, %v535_v60  ;;  %v557_v10 = vsel %vm545_vm4, %v535_v60, %v538_v61 }
 0x10c   : > { %v551_v14 = vsel %vm547_vm6, %v535_v60, %v550_v5  ;;  %v554_v15 = vsel %vm548_vm7, %v541_v63, 920167782  ;;  %v558_v16 = vsel %vm548_vm7, %v544_v1, 1326507024  ;;  %v741_v23 = vshll.u32 %v3467_v44, %v735_v43 }
 0x10d   : > { %v555_v18 = vsel %vm547_vm6, %v538_v61, %v554_v15  ;;  %v559_v19 = vsel %vm547_vm6, %v541_v63, %v558_v16  ;;  %v552_v24 = vsel %vm546_vm5, %v549_v2, %v551_v14  ;;  %v742_v28 = vshrl.u32 %v3468_v46, %v736_v62 }
 0x10e   : > { %v556_v26 = vsel %vm546_vm5, %v553_v6, %v555_v18  ;;  %v560_v27 = vsel %vm546_vm5, %v557_v10, %v559_v19  ;;  %v740_v35 = vor.u32 %v739_v20, %v738_v17  ;;  %v744_v41 = vshll.u32 %v3468_v46, %v735_v43 }
 0x10f   : > { %v3687_v29 = vmul.u32.u64.low %v3656_v36, %v560_v27  ;;  %v3688_v30 = vmul.u32.u64.high %v3656_v36, %v560_v27, %v3687_v29  ;;  %v3691_v32 = vmul.u32.u64.low %v3656_v36, %v556_v26  ;;  %v3692_v34 = vmul.u32.u64.high %v3656_v36, %v556_v26, %v3691_v32 }
 0x110   : > { %v743_v39 = vor.u32 %v742_v28, %v741_v23  ;;  %v745_v45 = vshrl.u32 %v3469_v48, %v736_v62  ;;  %v737_v33 = vshrl.u32 %v3466_v40, %v736_v62  ;;  %v747_v47 = vshll.u32 %v3469_v48, %v735_v43 }
 0x111   : > { %v748_v49 = vshrl.u32 %v3470_v50, %v736_v62  ;;  %v751_v51 = vshrl.u32 %v3471_v57, %v736_v62  ;;  %v568_v52 = vmul.u32 %v3656_v36, %v552_v24  ;;  %v750_v54 = vshll.u32 %v3470_v50, %v735_v43 }
 0x112   : > { %v746_v53 = vor.u32 %v745_v45, %v744_v41  ;;  %vm753_vm9 = vcmp.lt.s32.totalorder %v3663_v42, 1  ;;  %vm570_vm10 = vc.u32 %v3688_v30, %v3691_v32  ;;  %v571_v55 = vadd.s32 1, %v3692_v34 }
 0x113   : > { %v749_v56 = vor.u32 %v748_v49, %v747_v47  ;;  %vm754_vm11 = vcmp.lt.s32.totalorder %v3663_v42, 2  ;;  %v752_v58 = vor.u32 %v751_v51, %v750_v54  ;;  %vm755_vm12 = vcmp.lt.s32.totalorder %v3663_v42, 3 }
 0x114   : > { %vm756_vm13 = vcmp.lt.s32.totalorder %v3663_v42, 4  ;;  %v761_v59 = vsel %vm753_vm9, %v740_v35, %v743_v39  ;;  %v572_v36 = vsel %vm570_vm10, %v571_v55, %v3692_v34  ;;  %v765_v61 = vsel %vm753_vm9, %v743_v39, %v746_v53 }
 0x115   : > { %v758_v60 = vsel %vm756_vm13, %v746_v53, 2102212464  ;;  %v762_v43 = vsel %vm756_vm13, %v749_v56, 920167782  ;;  %v573_v62 = vadd.s32 %v572_v36, %v568_v52  ;;  %v757_v63 = vsel %vm753_vm9, %v737_v33, %v740_v35 }
 0x116   : > { %v763_v1 = vsel %vm755_vm12, %v746_v53, %v762_v43  ;;  %v766_v2 = vsel %vm756_vm13, %v752_v58, 1326507024  ;;  %v759_v5 = vsel %vm755_vm12, %v743_v39, %v758_v60  ;;  %v629_v14 = vsel %vm628_vm8, %v3660_v38, 0 }
 0x117   : > { %v764_v6 = vsel %vm754_vm11, %v761_v59, %v763_v1  ;;  %v767_v10 = vsel %vm755_vm12, %v749_v56, %v766_v2  ;;  %v574_v15 = vadd.s32 536870912, %v573_v62  ;;  %v760_v24 = vsel %vm754_vm11, %v757_v63, %v759_v5 }
 0x118   : > { %v768_v16 = vsel %vm754_vm11, %v765_v61, %v767_v10  ;;  %v3719_v17 = vmul.u32.u64.low %v3658_v37, %v764_v6  ;;  %v3720_v18 = vmul.u32.u64.high %v3658_v37, %v764_v6, %v3719_v17  ;;  %v617_v38 = vand.u32 2147483647, %v3637_v11 }
 0x119   : > { %v3724_v19 = vmul.u32.u64.low %v3658_v37, %v768_v16  ;;  %v3725_v20 = vmul.u32.u64.high %v3658_v37, %v768_v16, %v3724_v19  ;;  %v3727_v23 = vshrl.u32 %v574_v15, 30  ;;  %v631_v26 = vand.u32 31, %v629_v14 }
 0x11a   : > { %v779_v28 = vadd.s32 1, %v3720_v18  ;;  %v776_v29 = vmul.u32 %v3658_v37, %v760_v24  ;;  %v624_v42 = vand.u32 8388607, %v617_v38  ;;  %v828_v33 = vand.u32 2139095040, %v3639_v12 }
 0x11b   : > { %v576_v27 = vshll.u32 %v3727_v23, 30  ;;  %vm778_vm14 = vc.u32 %v3725_v20, %v3719_v17  ;;  %v632_v41 = vsub.s32 32, %v631_v26  ;;  %v630_v59 = vshrl.u32 %v629_v14, 5 }
 0x11c   : > { %v780_v35 = vsel %vm778_vm14, %v779_v28, %v3720_v18  ;;  %v625_v51 = vor.u32 8388608, %v624_v42  ;;  %v829_v56 = vshrl.u32 %v828_v33, 23  ;;  %v634_v36 = vshll.u32 %v3466_v40, %v631_v26 }
 0x11d   : > { %v3737_v34 = vsub.s32 %v573_v62, %v576_v27  ;;  %v781_v39 = vadd.s32 %v780_v35, %v776_v29  ;;  %v635_v52 = vshrl.u32 %v3467_v44, %v632_v41  ;;  %v638_v54 = vshrl.u32 %v3468_v46, %v632_v41 }
 0x11e   : > { %v641_v55 = vshrl.u32 %v3469_v48, %v632_v41  ;;  %v644_v60 = vshrl.u32 %v3470_v50, %v632_v41  ;;  %v637_v61 = vshll.u32 %v3467_v44, %v631_v26  ;;  %v640_v62 = vshll.u32 %v3468_v46, %v631_v26 }
 0x11f   : > { %v579_v45 = vsub.s32 0, %v3737_v34  ;;  %v782_v47 = vadd.s32 536870912, %v781_v39  ;;  %v643_v63 = vshll.u32 %v3469_v48, %v631_v26  ;;  %v636_v2 = vor.u32 %v635_v52, %v634_v36 }
 0x120   : > { %v647_v5 = vshrl.u32 %v3471_v57, %v632_v41  ;;  %v665_v6 = vshll.u32 %v625_v51, 8  ;;  %v639_v10 = vor.u32 %v638_v54, %v637_v61  ;;  %v642_v14 = vor.u32 %v641_v55, %v640_v62 }
 0x121   : > { %v3060_v49 = vmin.u32 %v579_v45, %v3737_v34  ;;  %v3745_v37 = vshrl.u32 %v782_v47, 30  ;;  %v645_v15 = vor.u32 %v644_v60, %v643_v63  ;;  %v569_v16 = vadd.s32 %v3691_v32, %v3688_v30 }
 0x122   : > { %v646_v24 = vshll.u32 %v3470_v50, %v631_v26  ;;  %vm649_vm2 = vcmp.lt.s32.totalorder %v630_v59, 1  ;;  %v3071_v29 = vadd.s32 4294967169, %v829_v56  ;;  %vm652_vm3 = vcmp.lt.s32.totalorder %v630_v59, 4 }
 0x123   : > { %v581_v53 = vclz %v3060_v49  ;;  %v784_v58 = vshll.u32 %v3745_v37, 30  ;;  %v654_v33 = vsel %vm652_vm3, %v642_v14, 2102212464  ;;  %v657_v30 = vsel %vm649_vm2, %v636_v2, %v639_v10 }
 0x124   : > { %v648_v42 = vor.u32 %v647_v5, %v646_v24  ;;  %v658_v32 = vsel %vm652_vm3, %v645_v15, 920167782  ;;  %vm650_vm4 = vcmp.lt.s32.totalorder %v630_v59, 2  ;;  %vm651_vm5 = vcmp.lt.s32.totalorder %v630_v59, 3 }
 0x125   : > { %v3061_v43 = vadd.s32 4294967294, %v581_v53  ;;  %v3756_v1 = vsub.s32 %v781_v39, %v784_v58  ;;  %v633_v39 = vshrl.u32 %v3466_v40, %v632_v41  ;;  %v659_v52 = vsel %vm651_vm5, %v642_v14, %v658_v32 }
 0x126   : > { %v661_v53 = vsel %vm649_vm2, %v639_v10, %v642_v14  ;;  %v655_v54 = vsel %vm651_vm5, %v639_v10, %v654_v33  ;;  %v660_v55 = vsel %vm650_vm4, %v657_v30, %v659_v52  ;;  %v662_v56 = vsel %vm652_vm3, %v648_v42, 1326507024 }
 0x127   : > { %vm3062_vm15 = vcmp.lt.s32.totalorder %v3061_v43, 0  ;;  %v787_v19 = vsub.s32 0, %v3756_v1  ;;  %v653_v26 = vsel %vm649_vm2, %v633_v39, %v636_v2  ;;  %v663_v60 = vsel %vm651_vm5, %v645_v15, %v662_v56 }
 0x128   : > { %v584_v18 = vsel %vm3062_vm15, 0, %v3061_v43  ;;  %v835_v43 = vadd.s32 1, %v3071_v29  ;;  %v664_v61 = vsel %vm650_vm4, %v661_v53, %v663_v60  ;;  %v825_v24 = vand.u32 2147483647, %v3639_v12 }
 0x129   : > { %v585_v27 = vsub.s32 32, %v584_v18  ;;  %v589_v28 = vsub.s32 4294967266, %v584_v18  ;;  %v3068_v35 = vmin.u32 %v787_v19, %v3756_v1  ;;  %v586_v58 = vshll.u32 %v3737_v34, %v584_v18 }
 0x12a   : > { %v3774_v62 = vmul.u32.u64.low %v665_v6, %v660_v55  ;;  %v3775_v63 = vmul.u32.u64.high %v665_v6, %v660_v55, %v3774_v62  ;;  %v3778_v14 = vmul.u32.u64.low %v665_v6, %v664_v61  ;;  %v3779_v10 = vmul.u32.u64.high %v665_v6, %v664_v61, %v3778_v14 }
 0x12b   : > { %v590_v45 = vadd.s32 127, %v589_v28  ;;  %v789_v47 = vclz %v3068_v35  ;;  %v587_v49 = vshrl.u32 %v569_v16, %v585_v27  ;;  %v656_v16 = vsel %vm650_vm4, %v653_v26, %v655_v54 }
 0x12c   : > { %vm836_vm7 = vcmp.gt.s32.totalorder %v835_v43, 0  ;;  %v675_v15 = vadd.s32 1, %v3775_v63  ;;  %v672_v28 = vmul.u32 %v665_v6, %v656_v16  ;;  %vm674_vm8 = vc.u32 %v3779_v10, %v3774_v62 }
 0x12d   : > { %v591_v51 = vshll.u32 %v590_v45, 23  ;;  %v3069_v41 = vadd.s32 4294967294, %v789_v47  ;;  %v588_v2 = vor.u32 %v587_v49, %v586_v58  ;;  %v837_v34 = vsel %vm836_vm7, %v835_v43, 0 }
 0x12e   : > { %v839_v29 = vand.u32 31, %v837_v34  ;;  %v676_v35 = vsel %vm674_vm8, %v675_v15, %v3775_v63  ;;  %vm515_vm9 = vcmp.lt.s32.totalorder %v3631_v7, 0  ;;  %v832_v30 = vand.u32 8388607, %v825_v24 }
 0x12f   : > { %v592_v36 = vor.u32 4788187, %v591_v51  ;;  %vm3070_vm6 = vcmp.lt.s32.totalorder %v3069_v41, 0  ;;  %v595_v27 = vcvt.s32.f32 %v588_v2  ;;  %v677_v42 = vadd.s32 %v676_v35, %v672_v28 }
 0x130   : > { %v792_v5 = vsel %vm3070_vm6, 0, %v3069_v41  ;;  %v840_v59 = vsub.s32 32, %v839_v29  ;;  %v599_v32 = vsub.s32 4, %v3727_v23  ;;  %v777_v6 = vadd.s32 %v3719_v17, %v3725_v20 }
 0x131   : > { %v593_v19 = vand.u32 2147483647, %v592_v36  ;;  %v797_v18 = vsub.s32 4294967266, %v792_v5  ;;  %v678_v33 = vadd.s32 536870912, %v677_v42  ;;  %v793_v47 = vsub.s32 32, %v792_v5 }
 0x132   : > { %v3793_v26 = vshrl.u32 %v837_v34, 5  ;;  %v843_v52 = vshrl.u32 %v3467_v44, %v840_v59  ;;  %v846_v53 = vshrl.u32 %v3468_v46, %v840_v59  ;;  %v849_v54 = vshrl.u32 %v3469_v48, %v840_v59 }
 0x133   : > { %v596_v39 = vmul.f32 %v595_v27, %v593_v19  ;;  %v798_v45 = vadd.s32 127, %v797_v18  ;;  %v3795_v51 = vshrl.u32 %v678_v33, 30  ;;  %v851_v55 = vshll.u32 %v3469_v48, %v839_v29 }
 0x134   : > { %v852_v56 = vshrl.u32 %v3470_v50, %v840_v59  ;;  %v842_v17 = vshll.u32 %v3466_v40, %v839_v29  ;;  %v845_v20 = vshll.u32 %v3467_v44, %v839_v29  ;;  %v855_v36 = vshrl.u32 %v3471_v57, %v840_v59 }
 0x135   : > { %v597_v49 = vxor.u32 2147483648, %v596_v39  ;;  %v799_v41 = vshll.u32 %v798_v45, 23  ;;  %v680_v58 = vshll.u32 %v3795_v51, 30  ;;  %v795_v60 = vshrl.u32 %v777_v6, %v793_v47 }
 0x136   : > { %v848_v43 = vshll.u32 %v3468_v46, %v839_v29  ;;  %v853_v61 = vor.u32 %v852_v56, %v851_v55  ;;  %v854_v63 = vshll.u32 %v3470_v50, %v839_v29  ;;  %vm3810_vm10 = vcmp.le.f32.partialorder %v513_v9, 0.7853982 }
 0x137   : > { %v3814_v14 = vsub.s32 %v677_v42, %v680_v58  ;;  %v844_v16 = vor.u32 %v843_v52, %v842_v17  ;;  %v847_v19 = vor.u32 %v846_v53, %v845_v20  ;;  %v598_v34 = vsel %vm515_vm9, %v597_v49, %v596_v39 }
 0x138   : > { %v794_v18 = vshll.u32 %v3756_v1, %v792_v5  ;;  %v850_v15 = vor.u32 %v849_v54, %v848_v43  ;;  %v856_v27 = vor.u32 %v855_v36, %v854_v63  ;;  %v800_v28 = vor.u32 4788187, %v799_v41 }
 0x139   : > { %v683_v29 = vsub.s32 0, %v3814_v14  ;;  %v833_v35 = vor.u32 8388608, %v832_v30  ;;  %vm860_vm11 = vcmp.lt.s32.totalorder %v3793_v26, 4  ;;  %v600_v9 = vsel %vm515_vm9, %v599_v32, %v3727_v23 }
 0x13a   : > { %v796_v42 = vor.u32 %v795_v60, %v794_v18  ;;  %vm857_vm12 = vcmp.lt.s32.totalorder %v3793_v26, 1  ;;  %v866_v39 = vsel %vm860_vm11, %v853_v61, 920167782  ;;  %v601_v1 = vsel %vm3810_vm10, %v3631_v7, %v598_v34 }
 0x13b   : > { %vm859_vm13 = vcmp.lt.s32.totalorder %v3793_v26, 3  ;;  %v865_v5 = vsel %vm857_vm12, %v844_v16, %v847_v19  ;;  %v3064_v45 = vmin.u32 %v683_v29, %v3814_v14  ;;  %v869_v33 = vsel %vm857_vm12, %v847_v19, %v850_v15 }
 0x13c   : > { %v867_v23 = vsel %vm859_vm13, %v850_v15, %v866_v39  ;;  %v870_v30 = vsel %vm860_vm11, %v856_v27, 1326507024  ;;  %v602_v32 = vsel %vm3810_vm10, 0, %v600_v9  ;;  %v801_v6 = vand.u32 2147483647, %v800_v28 }
 0x13d   : > { %vm858_vm14 = vcmp.lt.s32.totalorder %v3793_v26, 2  ;;  %v871_v47 = vsel %vm859_vm13, %v853_v61, %v870_v30  ;;  %v803_v49 = vcvt.s32.f32 %v796_v42  ;;  %v807_v52 = vsub.s32 4, %v3745_v37 }
 0x13e   : > { %v872_v53 = vsel %vm858_vm14, %v869_v33, %v871_v47  ;;  %v873_v41 = vshll.u32 %v833_v35, 8  ;;  %3319 = vcosq.f32 %v601_v1  ;;  %v841_v54 = vshrl.u32 %v3466_v40, %v840_v59 }
 0x13f   : > { %v862_v55 = vsel %vm860_vm11, %v850_v15, 2102212464  ;;  %v868_v56 = vsel %vm858_vm14, %v865_v5, %v867_v23  ;;  %3321 = vsinq.f32 %v601_v1  ;;  %v685_v58 = vclz %v3064_v45 }
 0x140   : > { %v3853_v17 = vmul.u32.u64.low %v873_v41, %v872_v53  ;;  %v3854_v20 = vmul.u32.u64.high %v873_v41, %v872_v53, %v3853_v17  ;;  %v804_v36 = vmul.f32 %v803_v49, %v801_v6  ;;  %v861_v60 = vsel %vm857_vm12, %v841_v54, %v844_v16 }
 0x141   : > { %v863_v43 = vsel %vm859_vm13, %v847_v19, %v862_v55  ;;  %v3860_v61 = vmul.u32.u64.low %v873_v41, %v868_v56  ;;  %v3861_v59 = vmul.u32.u64.high %v873_v41, %v868_v56, %v3860_v61  ;;  %v606_v63 = vadd.s32 3, %v602_v32 }
 0x142   : > { %vm723_vm15 = vcmp.lt.s32.totalorder %v3633_v8, 0  ;;  %v932_v2 = vand.u32 2139095040, %v3648_v21  ;;  %v3065_v18 = vadd.s32 4294967294, %v685_v58  ;;  %v805_v15 = vxor.u32 2147483648, %v804_v36 }
 0x143   : > { %v808_v34 = vsel %vm723_vm15, %v807_v52, %v3745_v37  ;;  %v864_v16 = vsel %vm858_vm14, %v861_v60, %v863_v43  ;;  %vm882_vm2 = vc.u32 %v3854_v20, %v3860_v61  ;;  %vm3875_vm3 = vcmp.le.f32.partialorder %v721_v13, 0.7853982 }
 0x144   : > { %v933_v19 = vshrl.u32 %v932_v2, 23  ;;  %v883_v28 = vadd.s32 1, %v3861_v59  ;;  %v3880_v29 = vand.u32 3, %v606_v63  ;;  %v3882_v37 = vand.u32 3, %v602_v32 }
 0x145   : > { %v810_v26 = vsel %vm3875_vm3, 0, %v808_v34  ;;  %vm3066_vm4 = vcmp.lt.s32.totalorder %v3065_v18, 0  ;;  %v880_v35 = vmul.u32 %v873_v41, %v864_v16  ;;  %v806_v13 = vsel %vm723_vm15, %v805_v15, %v804_v36 }
 0x146   : > { %v884_v9 = vsel %vm882_vm2, %v883_v28, %v3861_v59  ;;  %v3075_v42 = vadd.s32 4294967169, %v933_v19  ;;  %v929_v45 = vand.u32 2147483647, %v3648_v21  ;;  %vm1440_vm5 = vcmp.eq.s32.totalorder %v3882_v37, 0 }
 0x147   : > { %v885_v5 = vadd.s32 %v884_v9, %v880_v35  ;;  %vm1443_vm6 = vcmp.eq.s32.totalorder %v3882_v37, 2  ;;  %v814_v33 = vadd.s32 3, %v810_v26  ;;  %v3892_v30 = vsel %vm3066_vm4, 0, %v3065_v18 }
 0x148   : > { %v3320_v39 = vpop.eup %3319  ;;  %v939_v23 = vadd.s32 1, %v3075_v42  ;;  %vm609_vm7 = vcmp.eq.s32.totalorder %v3880_v29, 0  ;;  %v809_v32 = vsel %vm3875_vm3, %v3633_v8, %v806_v13  ;;  %vm612_vm9 = vcmp.eq.s32.totalorder %v3880_v29, 2 }
 0x149   : > { %v3322_v1 = vpop.eup %3321  ;;  %v886_v6 = vadd.s32 536870912, %v885_v5  ;;  %v613_v49 = vxor.u32 2147483648, %v3320_v39  ;;  %v693_v53 = vsub.s32 4294967266, %v3892_v30  ;;  %v936_v54 = vand.u32 8388607, %v929_v45 }
 0x14a   : > { %vm940_vm8 = vcmp.gt.s32.totalorder %v939_v23, 0  ;;  %v610_v47 = vxor.u32 2147483648, %v3322_v1  ;;  %3323 = vcosq.f32 %v809_v32  ;;  %v3904_v56 = vand.u32 3, %v814_v33 }
 0x14b   : > { %v941_v52 = vsel %vm940_vm8, %v939_v23, 0  ;;  %v3900_v41 = vshrl.u32 %v886_v6, 30  ;;  %v3906_v58 = vand.u32 3, %v810_v26  ;;  %v673_v17 = vadd.s32 %v3774_v62, %v3779_v10 }
 0x14c   : > { %v943_v55 = vand.u32 31, %v941_v52  ;;  %3325 = vsinq.f32 %v809_v32  ;;  %v703_v36 = vsub.s32 4, %v3795_v51  ;;  %v611_v59 = vsel %vm609_vm7, %v3320_v39, %v610_v47 }
 0x14d   : > { %v888_v60 = vshll.u32 %v3900_v41, 30  ;;  %v614_v63 = vsel %vm612_vm9, %v613_v49, %v3322_v1  ;;  %v1442_v2 = vsel %vm1440_vm5, %v3320_v39, %v610_v47  ;;  %v1445_v34 = vsel %vm1443_vm6, %v613_v49, %v3322_v1 }
 0x14e   : > { %v944_v43 = vsub.s32 32, %v943_v55  ;;  %v689_v62 = vsub.s32 32, %v3892_v30  ;;  %v694_v10 = vadd.s32 127, %v693_v53  ;;  %v937_v18 = vor.u32 8388608, %v936_v54 }
 0x14f   : > { %v1140_v15 = vand.u32 2139095040, %v3650_v22  ;;  %v946_v16 = vshll.u32 %v3466_v40, %v943_v55  ;;  %v949_v27 = vshll.u32 %v3467_v44, %v943_v55  ;;  %v3926_v26 = vsub.s32 %v885_v5, %v888_v60 }
 0x150   : > { %v947_v19 = vshrl.u32 %v3467_v44, %v944_v43  ;;  %v950_v28 = vshrl.u32 %v3468_v46, %v944_v43  ;;  %v942_v35 = vshrl.u32 %v941_v52, 5  ;;  %v952_v9 = vshll.u32 %v3468_v46, %v943_v55 }
 0x151   : > { %v955_v42 = vshll.u32 %v3469_v48, %v943_v55  ;;  %vm608_vm10 = vcmp.lt.s32.totalorder %v3880_v29, 2  ;;  %vm1439_vm11 = vcmp.lt.s32.totalorder %v3882_v37, 2  ;;  %vm619_vm12 = vcmp.lt.s32.totalorder %v3637_v11, 0 }
 0x152   : > { %v948_v39 = vor.u32 %v947_v19, %v946_v16  ;;  %v951_v13 = vor.u32 %v950_v28, %v949_v27  ;;  %v953_v1 = vshrl.u32 %v3469_v48, %v944_v43  ;;  %v956_v23 = vshrl.u32 %v3470_v50, %v944_v43 }
 0x153   : > { %v690_v5 = vshll.u32 %v3814_v14, %v3892_v30  ;;  %v691_v33 = vshrl.u32 %v673_v17, %v689_v62  ;;  %v958_v32 = vshll.u32 %v3470_v50, %v943_v55  ;;  %v959_v6 = vshrl.u32 %v3471_v57, %v944_v43 }
 0x154   : > { %v695_v47 = vshll.u32 %v694_v10, 23  ;;  %v954_v49 = vor.u32 %v953_v1, %v952_v9  ;;  %v957_v52 = vor.u32 %v956_v23, %v955_v42  ;;  %v1141_v53 = vshrl.u32 %v1140_v15, 23  ;;  %v3939_v16 = vpop.eup %3323 }
 0x155   : > { %v960_v54 = vor.u32 %v959_v6, %v958_v32  ;;  %vm961_vm13 = vcmp.lt.s32.totalorder %v942_v35, 1  ;;  %vm964_vm14 = vcmp.lt.s32.totalorder %v942_v35, 4  ;;  %v977_v60 = vshll.u32 %v937_v18, 8 }
 0x156   : > { %vm605_vm15 = vweird.f32 %v3631_v7  ;;  %vm3944_vm2 = vcmp.le.f32.partialorder %v617_v38, 0.7853982  ;;  %v891_v30 = vsub.s32 0, %v3926_v26  ;;  %vm963_vm3 = vcmp.lt.s32.totalorder %v942_v35, 3  ;;  %v3951_v62 = vpop.eup %3325 }
 0x157   : > { %v969_v55 = vsel %vm961_vm13, %v948_v39, %v951_v13  ;;  %v970_v17 = vsel %vm964_vm14, %v957_v52, 920167782  ;;  %vm962_vm4 = vcmp.lt.s32.totalorder %v942_v35, 2  ;;  %v966_v10 = vsel %vm964_vm14, %v954_v49, 2102212464 }
 0x158   : > { %v971_v18 = vsel %vm963_vm3, %v954_v49, %v970_v17  ;;  %v973_v15 = vsel %vm961_vm13, %v951_v13, %v954_v49  ;;  %v945_v38 = vshrl.u32 %v3466_v40, %v944_v43  ;;  %v974_v27 = vsel %vm964_vm14, %v960_v54, 1326507024 }
 0x159   : > { %v972_v19 = vsel %vm962_vm4, %v969_v55, %v971_v18  ;;  %v3083_v28 = vadd.s32 4294967169, %v1141_v53  ;;  %v696_v9 = vor.u32 4788187, %v695_v47  ;;  %v975_v42 = vsel %vm963_vm3, %v957_v52, %v974_v27 }
 0x15a   : > { %v3960_v1 = vmul.u32.u64.low %v977_v60, %v972_v19  ;;  %v3961_v23 = vmul.u32.u64.high %v977_v60, %v972_v19, %v3960_v1  ;;  %v965_v32 = vsel %vm961_vm13, %v945_v38, %v948_v39  ;;  %v967_v6 = vsel %vm963_vm3, %v951_v13, %v966_v10 }
 0x15b   : > { %v976_v49 = vsel %vm962_vm4, %v973_v15, %v975_v42  ;;  %v1147_v17 = vadd.s32 1, %v3083_v28  ;;  %v615_v43 = vsel %vm608_vm10, %v611_v59, %v614_v63  ;;  %v1446_v53 = vsel %vm1439_vm11, %v1442_v2, %v1445_v34 }
 0x15c   : > { %v704_v47 = vsel %vm619_vm12, %v703_v36, %v3795_v51  ;;  %v3072_v52 = vmin.u32 %v891_v30, %v3926_v26  ;;  %v692_v39 = vor.u32 %v691_v33, %v690_v5  ;;  %v968_v55 = vsel %vm962_vm4, %v965_v32, %v967_v6 }
 0x15d   : > { %v3977_v54 = vmul.u32.u64.low %v977_v60, %v976_v49  ;;  %v3978_v13 = vmul.u32.u64.high %v977_v60, %v976_v49, %v3977_v54  ;;  %vm1148_vm5 = vcmp.gt.s32.totalorder %v1147_v17, 0  ;;  %v987_v29 = vadd.s32 1, %v3961_v23 }
 0x15e   : > { %v1137_v37 = vand.u32 2147483647, %v3650_v22  ;;  %v1149_v59 = vsel %vm1148_vm5, %v1147_v17, 0  ;;  %vm817_vm6 = vcmp.eq.s32.totalorder %v3904_v56, 0  ;;  %vm820_vm7 = vcmp.eq.s32.totalorder %v3904_v56, 2 }
 0x15f   : > { %v697_v63 = vand.u32 2147483647, %v696_v9  ;;  %v1151_v51 = vand.u32 31, %v1149_v59  ;;  %v3987_v36 = vsel %vm605_vm15, nan, %v615_v43  ;;  %v3991_v2 = vsel %vm605_vm15, nan, %v1446_v53 }
 0x160   : > { %v3995_v34 = vsel %vm3944_vm2, 0, %v704_v47  ;;  %v893_v35 = vclz %v3072_v52  ;;  %v699_v5 = vcvt.s32.f32 %v692_v39  ;;  %v984_v33 = vmul.u32 %v977_v60, %v968_v55 }
 0x161   : > { %vm986_vm8 = vc.u32 %v3978_v13, %v3960_v1  ;;  %v3999_v30 = vsub.s32 32, %v1151_v51  ;;  %v818_v10 = vxor.u32 2147483648, %v3951_v62  ;;  %v821_v18 = vxor.u32 2147483648, %v3939_v16 }
 0x162   : > { %v988_v7 = vsel %vm986_vm8, %v987_v29, %v3961_v23  ;;  %v1144_v15 = vand.u32 8388607, %v1137_v37  ;;  %vm816_vm9 = vcmp.lt.s32.totalorder %v3904_v56, 2  ;;  %vm1646_vm10 = vcmp.eq.s32.totalorder %v3906_v58, 0 }
 0x163   : > { %vm1649_vm11 = vcmp.eq.s32.totalorder %v3906_v58, 2  ;;  %v700_v60 = vmul.f32 %v699_v5, %v697_v63  ;;  %v989_v38 = vadd.s32 %v988_v7, %v984_v33  ;;  %v1155_v19 = vshrl.u32 %v3467_v44, %v3999_v30 }
 0x164   : > { %v1158_v27 = vshrl.u32 %v3468_v46, %v3999_v30  ;;  %v3073_v28 = vadd.s32 4294967294, %v893_v35  ;;  %v4013_v9 = vshrl.u32 %v1149_v59, 5  ;;  %v1154_v42 = vshll.u32 %v3466_v40, %v1151_v51 }
 0x165   : > { %v1161_v23 = vshrl.u32 %v3469_v48, %v3999_v30  ;;  %v990_v32 = vadd.s32 536870912, %v989_v38  ;;  %v1157_v6 = vshll.u32 %v3467_v44, %v1151_v51  ;;  %v1163_v49 = vshll.u32 %v3469_v48, %v1151_v51 }
 0x166   : > { %v1164_v17 = vshrl.u32 %v3470_v50, %v3999_v30  ;;  %v822_v43 = vsel %vm820_vm7, %v821_v18, %v3951_v62  ;;  %vm1645_vm13 = vcmp.lt.s32.totalorder %v3906_v58, 2  ;;  %v1160_v53 = vshll.u32 %v3468_v46, %v1151_v51 }
 0x167   : > { %v1167_v47 = vshrl.u32 %v3471_v57, %v3999_v30  ;;  %v1036_v52 = vand.u32 2139095040, %v3652_v25  ;;  %v4030_v39 = vshrl.u32 %v990_v32, 30  ;;  %v1156_v54 = vor.u32 %v1155_v19, %v1154_v42 }
 0x168   : > { %v1159_v55 = vor.u32 %v1158_v27, %v1157_v6  ;;  %v1165_v29 = vor.u32 %v1164_v17, %v1163_v49  ;;  %v819_v59 = vsel %vm817_vm6, %v3939_v16, %v818_v10  ;;  %v701_v63 = vxor.u32 2147483648, %v700_v60 }
 0x169   : > { %v1162_v35 = vor.u32 %v1161_v23, %v1160_v53  ;;  %v1166_v5 = vshll.u32 %v3470_v50, %v1151_v51  ;;  %vm3074_vm14 = vcmp.lt.s32.totalorder %v3073_v28, 0  ;;  %v992_v33 = vshll.u32 %v4030_v39, 30 }
 0x16a   : > { %v1145_v7 = vor.u32 8388608, %v1144_v15  ;;  %vm1172_vm15 = vcmp.lt.s32.totalorder %v4013_v9, 4  ;;  %vm1169_vm3 = vcmp.lt.s32.totalorder %v4013_v9, 1  ;;  %v1037_v27 = vshrl.u32 %v1036_v52, 23 }
 0x16b   : > { %v1168_v0 = vor.u32 %v1167_v47, %v1166_v5  ;;  %v1178_v19 = vsel %vm1172_vm15, %v1165_v29, 920167782  ;;  %vm813_vm4 = vweird.f32 %v3633_v8  ;;  %v4044_v42 = vadd.s32 %v3860_v61, %v3854_v20 }
 0x16c   : > { %v4046_v51 = vsub.s32 %v989_v38, %v992_v33  ;;  %vm1171_vm5 = vcmp.lt.s32.totalorder %v4013_v9, 3  ;;  %v1177_v15 = vsel %vm1169_vm3, %v1156_v54, %v1159_v55  ;;  %v823_v23 = vsel %vm816_vm9, %v819_v59, %v822_v43 }
 0x16d   : > { %v1648_v32 = vsel %vm1646_vm10, %v3939_v16, %v818_v10  ;;  %v1651_v6 = vsel %vm1649_vm11, %v821_v18, %v3951_v62  ;;  %v1179_v20 = vsel %vm1171_vm5, %v1162_v35, %v1178_v19  ;;  %v702_v61 = vsel %vm619_vm12, %v701_v63, %v700_v60 }
 0x16e   : > { %v4064_v38 = vsel %vm3074_vm14, 0, %v3073_v28  ;;  %v995_v56 = vsub.s32 0, %v4046_v51  ;;  %vm1170_vm6 = vcmp.lt.s32.totalorder %v4013_v9, 2  ;;  %vm931_vm7 = vcmp.lt.s32.totalorder %v3648_v21, 0 }
 0x16f   : > { %v1180_v16 = vsel %vm1170_vm6, %v1177_v15, %v1179_v20  ;;  %v1182_v62 = vsel %vm1172_vm15, %v1168_v0, 1326507024  ;;  %v1185_v10 = vshll.u32 %v1145_v7, 8  ;;  %v3079_v18 = vadd.s32 4294967169, %v1037_v27 }
 0x170   : > { %v4075_v60 = vsel %vm1645_vm13, %v1648_v32, %v1651_v6  ;;  %v3076_v28 = vmin.u32 %v995_v56, %v4046_v51  ;;  %v1174_v49 = vsel %vm1172_vm15, %v1162_v35, 2102212464  ;;  %v1181_v17 = vsel %vm1169_vm3, %v1159_v55, %v1162_v35 }
 0x171   : > { %v1153_v43 = vshrl.u32 %v3466_v40, %v3999_v30  ;;  %v1183_v0 = vsel %vm1171_vm5, %v1165_v29, %v1182_v62  ;;  %v4086_v53 = vmul.u32.u64.low %v1185_v10, %v1180_v16  ;;  %v4087_v47 = vmul.u32.u64.high %v1185_v10, %v1180_v16, %v4086_v53 }
 0x172   : > { %v4093_v58 = vsel %vm3944_vm2, %v3637_v11, %v702_v61  ;;  %v901_v52 = vsub.s32 4294967266, %v4064_v38  ;;  %v997_v59 = vclz %v3076_v28  ;;  %v1033_v63 = vand.u32 2147483647, %v3652_v25 }
 0x173   : > { %v1173_v30 = vsel %vm1169_vm3, %v1153_v43, %v1156_v54  ;;  %v1175_v29 = vsel %vm1171_vm5, %v1159_v55, %v1174_v49  ;;  %v1184_v35 = vsel %vm1170_vm6, %v1181_v17, %v1183_v0  ;;  %v1043_v5 = vadd.s32 1, %v3079_v18 }
 0x174   : > { %v3077_v33 = vadd.s32 4294967294, %v997_v59  ;;  %v1015_v14 = vsub.s32 4, %v4030_v39  ;;  %v4104_v7 = vmul.u32.u64.low %v1185_v10, %v1184_v35  ;;  %v4105_v19 = vmul.u32.u64.high %v1185_v10, %v1184_v35, %v4104_v7 }
 0x175   : > { %v4109_v27 = vsel %vm813_vm4, nan, %v823_v23  ;;  %3327 = vcosq.f32 %v4093_v58  ;;  %v897_v54 = vsub.s32 32, %v4064_v38  ;;  %vm1044_vm12 = vcmp.gt.s32.totalorder %v1043_v5, 0 }
 0x176   : > { %vm3078_vm2 = vcmp.lt.s32.totalorder %v3077_v33, 0  ;;  %v1176_v55 = vsel %vm1170_vm6, %v1173_v30, %v1175_v29  ;;  %v1195_v15 = vadd.s32 1, %v4087_v47  ;;  %v1045_v32 = vsel %vm1044_vm12, %v1043_v5, 0 }
 0x177   : > { %v4116_v6 = vadd.s32 127, %v901_v52  ;;  %v1000_v20 = vsel %vm3078_vm2, 0, %v3077_v33  ;;  %v1040_v61 = vand.u32 8388607, %v1033_v63  ;;  %v1047_v23 = vand.u32 31, %v1045_v32 }
 0x178   : > { %v985_v56 = vadd.s32 %v3960_v1, %v3978_v13  ;;  %v1001_v16 = vsub.s32 32, %v1000_v20  ;;  %v1005_v62 = vsub.s32 4294967266, %v1000_v20  ;;  %v1016_v9 = vsel %vm931_vm7, %v1015_v14, %v4030_v39 }
 0x179   : > { %v1192_v18 = vmul.u32 %v1185_v10, %v1176_v55  ;;  %vm1194_vm8 = vc.u32 %v4105_v19, %v4086_v53  ;;  %v4127_v28 = vshrl.u32 %v1045_v32, 5  ;;  %v1048_v49 = vsub.s32 32, %v1047_v23 }
 0x17a   : > { %v1002_v17 = vshll.u32 %v4046_v51, %v1000_v20  ;;  %v1003_v43 = vshrl.u32 %v985_v56, %v1001_v16  ;;  %v1006_v0 = vadd.s32 127, %v1005_v62  ;;  %v1196_v52 = vsel %vm1194_vm8, %v1195_v15, %v4087_v47 }
 0x17b   : > { %v1197_v1 = vadd.s32 %v1196_v52, %v1192_v18  ;;  %v1050_v13 = vshll.u32 %v3466_v40, %v1047_v23  ;;  %v1051_v59 = vshrl.u32 %v3467_v44, %v1048_v49  ;;  %v1054_v39 = vshrl.u32 %v3468_v46, %v1048_v49 }
 0x17c   : > { %vm4136_vm9 = vcmp.le.f32.partialorder %v929_v45, 0.7853982  ;;  %v1004_v30 = vor.u32 %v1003_v43, %v1002_v17  ;;  %v1007_v29 = vshll.u32 %v1006_v0, 23  ;;  %v1053_v51 = vshll.u32 %v3467_v44, %v1047_v23 }
 0x17d   : > { %v1057_v35 = vshrl.u32 %v3469_v48, %v1048_v49  ;;  %v1198_v47 = vadd.s32 536870912, %v1197_v1  ;;  %v1056_v5 = vshll.u32 %v3468_v46, %v1047_v23  ;;  %v1059_v33 = vshll.u32 %v3469_v48, %v1047_v23 }
 0x17e   : > { %v1060_v14 = vshrl.u32 %v3470_v50, %v1048_v49  ;;  %v1008_v7 = vor.u32 4788187, %v1007_v29  ;;  %v1041_v55 = vor.u32 8388608, %v1040_v61  ;;  %v1052_v15 = vor.u32 %v1051_v59, %v1050_v13 }
 0x17f   : > { %v1055_v45 = vor.u32 %v1054_v39, %v1053_v51  ;;  %v4145_v32 = vpop.eup %3327  ;;  %v4147_v20 = vshrl.u32 %v1198_v47, 30  ;;  %v1058_v56 = vor.u32 %v1057_v35, %v1056_v5  ;;  %v1063_v62 = vshrl.u32 %v3471_v57, %v1048_v49 }
 0x180   : > { %v1061_v16 = vor.u32 %v1060_v14, %v1059_v33  ;;  %v1009_v18 = vand.u32 2147483647, %v1008_v7  ;;  %v1011_v17 = vcvt.s32.f32 %v1004_v30  ;;  %v1062_v43 = vshll.u32 %v3470_v50, %v1047_v23 }
 0x181   : > { %v1244_v0 = vand.u32 2139095040, %v3654_v31  ;;  %v1200_v52 = vshll.u32 %v4147_v20, 30  ;;  %vm1065_vm10 = vcmp.lt.s32.totalorder %v4127_v28, 1  ;;  %vm1067_vm11 = vcmp.lt.s32.totalorder %v4127_v28, 3 }
 0x182   : > { %vm1068_vm13 = vcmp.lt.s32.totalorder %v4127_v28, 4  ;;  %v1012_v61 = vmul.f32 %v1011_v17, %v1009_v18  ;;  %v1064_v13 = vor.u32 %v1063_v62, %v1062_v43  ;;  %v1073_v59 = vsel %vm1065_vm10, %v1052_v15, %v1055_v45 }
 0x183   : > { %v1074_v39 = vsel %vm1068_vm13, %v1061_v16, 920167782  ;;  %3329 = vsinq.f32 %v4093_v58  ;;  %v4161_v23 = vsub.s32 %v1197_v1, %v1200_v52  ;;  %vm1066_vm14 = vcmp.lt.s32.totalorder %v4127_v28, 2 }
 0x184   : > { %v1075_v30 = vsel %vm1067_vm11, %v1058_v56, %v1074_v39  ;;  %v899_v29 = vshrl.u32 %v4044_v42, %v897_v54  ;;  %v1013_v51 = vxor.u32 2147483648, %v1012_v61  ;;  %v1081_v47 = vshll.u32 %v1041_v55, 8 }
 0x185   : > { %v1076_v35 = vsel %vm1066_vm14, %v1073_v59, %v1075_v30  ;;  %v903_v5 = vshll.u32 %v4116_v6, 23  ;;  %v1018_v33 = vsel %vm4136_vm9, 0, %v1016_v9  ;;  %v1203_v58 = vsub.s32 0, %v4161_v23 }
 0x186   : > { %v1245_v1 = vshrl.u32 %v1244_v0, 23  ;;  %v1014_v14 = vsel %vm931_vm7, %v1013_v51, %v1012_v61  ;;  %v1078_v7 = vsel %vm1068_vm13, %v1064_v13, 1326507024  ;;  %v1070_v9 = vsel %vm1068_vm13, %v1058_v56, 2102212464 }
 0x187   : > { %v4177_v42 = vmul.u32.u64.low %v1081_v47, %v1076_v35  ;;  %v4178_v54 = vmul.u32.u64.high %v1081_v47, %v1076_v35, %v4177_v42  ;;  %v1017_v6 = vsel %vm4136_vm9, %v3648_v21, %v1014_v14  ;;  %v3084_v55 = vmin.u32 %v1203_v58, %v4161_v23 }
 0x188   : > { %v1077_v62 = vsel %vm1065_vm10, %v1055_v45, %v1058_v56  ;;  %3331 = vcosq.f32 %v1017_v6  ;;  %v1022_v18 = vadd.s32 3, %v1018_v33  ;;  %v1049_v17 = vshrl.u32 %v3466_v40, %v1048_v49 }
 0x189   : > { %v1079_v43 = vsel %vm1067_vm11, %v1061_v16, %v1078_v7  ;;  %v4195_v10 = vsel %vm813_vm4, nan, %v4075_v60  ;;  %v898_v0 = vshll.u32 %v3926_v26, %v4064_v38  ;;  %3333 = vsinq.f32 %v1017_v6 }
 0x18a   : > { %v1205_v52 = vclz %v3084_v55  ;;  %v1850_v61 = vand.u32 3, %v1018_v33  ;;  %vm1139_vm15 = vcmp.lt.s32.totalorder %v3650_v22, 0  ;;  %v1069_v56 = vsel %vm1065_vm10, %v1049_v17, %v1052_v15 }
 0x18b   : > { %v1071_v49 = vsel %vm1067_vm11, %v1055_v45, %v1070_v9  ;;  %v1080_v16 = vsel %vm1066_vm14, %v1077_v62, %v1079_v43  ;;  %v3087_v59 = vadd.s32 4294967169, %v1245_v1  ;;  %v4209_v26 = vor.u32 %v899_v29, %v898_v0 }
 0x18c   : > { %v3085_v8 = vadd.s32 4294967294, %v1205_v52  ;;  %v4206_v60 = vmul.u32.u64.low %v1081_v47, %v1080_v16  ;;  %v4207_v13 = vmul.u32.u64.high %v1081_v47, %v1080_v16, %v4206_v60  ;;  %v4211_v38 = vor.u32 4788187, %v903_v5 }
 0x18d   : > { %v1023_v39 = vand.u32 3, %v1022_v18  ;;  %v1241_v30 = vand.u32 2147483647, %v3654_v31  ;;  %v4214_v51 = vpop.eup %3329  ;;  %vm4218_vm3 = vcmp.le.f32.partialorder %v1137_v37, 0.7853982  ;;  %v1072_v45 = vsel %vm1066_vm14, %v1069_v56, %v1071_v49 }
 0x18e   : > { %vm3086_vm4 = vcmp.lt.s32.totalorder %v3085_v8, 0  ;;  %v1091_v29 = vadd.s32 1, %v4178_v54  ;;  %v1251_v35 = vadd.s32 1, %v3087_v59  ;;  %vm1851_vm5 = vcmp.lt.s32.totalorder %v1850_v61, 2 }
 0x18f   : > { %vm1852_vm6 = vcmp.eq.s32.totalorder %v1850_v61, 0  ;;  %vm1855_vm7 = vcmp.eq.s32.totalorder %v1850_v61, 2  ;;  %v1208_v5 = vsel %vm3086_vm4, 0, %v3085_v8  ;;  %vm1021_vm12 = vweird.f32 %v3648_v21 }
 0x190   : > { %v1193_v33 = vadd.s32 %v4086_v53, %v4105_v19  ;;  %v1209_v37 = vsub.s32 32, %v1208_v5  ;;  %v1213_v58 = vsub.s32 4294967266, %v1208_v5  ;;  %v1223_v1 = vsub.s32 4, %v4147_v20 }
 0x191   : > { %v1210_v14 = vshll.u32 %v4161_v23, %v1208_v5  ;;  %v1088_v28 = vmul.u32 %v1081_v47, %v1072_v45  ;;  %vm1090_vm2 = vc.u32 %v4207_v13, %v4177_v42  ;;  %vm1252_vm8 = vcmp.gt.s32.totalorder %v1251_v35, 0 }
 0x192   : > { %v1211_v7 = vshrl.u32 %v1193_v33, %v1209_v37  ;;  %v1214_v6 = vadd.s32 127, %v1213_v58  ;;  %v1092_v55 = vsel %vm1090_vm2, %v1091_v29, %v4178_v54  ;;  %v1253_v9 = vsel %vm1252_vm8, %v1251_v35, 0  ;;  %v3332_v62 = vpop.eup %3331 }
 0x193   : > { %vm1024_vm9 = vcmp.lt.s32.totalorder %v1023_v39, 2  ;;  %vm1025_vm10 = vcmp.eq.s32.totalorder %v1023_v39, 0  ;;  %v1093_v53 = vadd.s32 %v1092_v55, %v1088_v28  ;;  %v1255_v19 = vand.u32 31, %v1253_v9  ;;  %v3334_v18 = vpop.eup %3333 }
 0x194   : > { %v1029_v17 = vxor.u32 2147483648, %v3332_v62  ;;  %v1212_v43 = vor.u32 %v1211_v7, %v1210_v14  ;;  %v1215_v0 = vshll.u32 %v1214_v6, 23  ;;  %v1224_v23 = vsel %vm1139_vm15, %v1223_v1, %v4147_v20 }
 0x195   : > { %v1026_v47 = vxor.u32 2147483648, %v3334_v18  ;;  %vm1028_vm11 = vcmp.eq.s32.totalorder %v1023_v39, 2  ;;  %v1094_v52 = vadd.s32 536870912, %v1093_v53  ;;  %v1256_v56 = vsub.s32 32, %v1255_v19 }
 0x196   : > { %v1030_v49 = vsel %vm1028_vm11, %v1029_v17, %v3334_v18  ;;  %v1857_v54 = vsel %vm1855_vm7, %v1029_v17, %v3334_v18  ;;  %v1216_v16 = vor.u32 4788187, %v1215_v0  ;;  %v1248_v8 = vand.u32 8388607, %v1241_v30 }
 0x197   : > { %v1027_v60 = vsel %vm1025_vm10, %v3332_v62, %v1026_v47  ;;  %v1854_v59 = vsel %vm1852_vm6, %v3332_v62, %v1026_v47  ;;  %v1226_v45 = vsel %vm4218_vm3, 0, %v1224_v23  ;;  %v4243_v29 = vshrl.u32 %v1094_v52, 30 }
 0x198   : > { %v1031_v20 = vsel %vm1024_vm9, %v1027_v60, %v1030_v49  ;;  %v1858_v35 = vsel %vm1851_vm5, %v1854_v59, %v1857_v54  ;;  %v1217_v5 = vand.u32 2147483647, %v1216_v16  ;;  %v1219_v33 = vcvt.s32.f32 %v1212_v43 }
 0x199   : > { %v4249_v37 = vsel %vm1021_vm12, nan, %v1031_v20  ;;  %v4253_v58 = vsel %vm1021_vm12, nan, %v1858_v35  ;;  %v1096_v1 = vshll.u32 %v4243_v29, 30  ;;  %v1259_v14 = vshrl.u32 %v3467_v44, %v1256_v56 }
 0x19a   : > { %v3158_v39 = vpack.c.bf16 %v4249_v37, %v3987_v36  ;;  %v3170_v61 = vpack.c.bf16 %v4253_v58, %v3991_v2  ;;  %v1220_v28 = vmul.f32 %v1219_v33, %v1217_v5  ;;  %v1230_v7 = vadd.s32 3, %v1226_v45  ;;  %v3367_v37 = vld [vmem:[%s3603_s22] sm:$0x77] }
 0x19b   : > { %v4261_v6 = vand.u32 3, %v1226_v45  ;;  %v4263_v55 = vsub.s32 %v1093_v53, %v1096_v1  ;;  %v1258_v21 = vshll.u32 %v3466_v40, %v1255_v19  ;;  %v1262_v62 = vshrl.u32 %v3468_v46, %v1256_v56  ;;  %v2507_v2 = vld [vmem:[%s4573_s4] sm:$0xff] }
 0x19c   : > { %v1221_v18 = vxor.u32 2147483648, %v1220_v28  ;;  %v1249_v17 = vor.u32 8388608, %v1248_v8  ;;  %v1261_v43 = vshll.u32 %v3467_v44, %v1255_v19  ;;  %v1265_v0 = vshrl.u32 %v3469_v48, %v1256_v56 }
 0x19d   : > { %v1099_v23 = vsub.s32 0, %v4263_v55  ;;  %v1254_v47 = vshrl.u32 %v1253_v9, 5  ;;  %v1260_v52 = vor.u32 %v1259_v14, %v1258_v21  ;;  %v1264_v49 = vshll.u32 %v3468_v46, %v1255_v19 }
 0x19e   : > { %v1222_v53 = vsel %vm1139_vm15, %v1221_v18, %v1220_v28  ;;  %v1263_v54 = vor.u32 %v1262_v62, %v1261_v43  ;;  %v1267_v16 = vshll.u32 %v3469_v48, %v1255_v19  ;;  %v1268_v60 = vshrl.u32 %v3470_v50, %v1256_v56 }
 0x19f   : > { %v1225_v44 = vsel %vm4218_vm3, %v3650_v22, %v1222_v53  ;;  %v4278_v8 = vand.u32 3, %v1230_v7  ;;  %v3080_v59 = vmin.u32 %v1099_v23, %v4263_v55  ;;  %v1266_v9 = vor.u32 %v1265_v0, %v1264_v49 }
 0x1a0   : > { %3335 = vcosq.f32 %v1225_v44  ;;  %v1269_v45 = vor.u32 %v1268_v60, %v1267_v16  ;;  %v1270_v46 = vshll.u32 %v3470_v50, %v1255_v19  ;;  %v1271_v20 = vshrl.u32 %v3471_v57, %v1256_v56 }
 0x1a1   : > { %3337 = vsinq.f32 %v1225_v44  ;;  %v1101_v35 = vclz %v3080_v59  ;;  %vm1273_vm13 = vcmp.lt.s32.totalorder %v1254_v47, 1  ;;  %v1289_v48 = vshll.u32 %v1249_v17, 8 }
 0x1a2   : > { %v1089_v5 = vadd.s32 %v4177_v42, %v4207_v13  ;;  %v1272_v15 = vor.u32 %v1271_v20, %v1270_v46  ;;  %vm1276_vm14 = vcmp.lt.s32.totalorder %v1254_v47, 4  ;;  %v1281_v33 = vsel %vm1273_vm13, %v1260_v52, %v1263_v54 }
 0x1a3   : > { %v3081_v1 = vadd.s32 4294967294, %v1101_v35  ;;  %vm1275_vm15 = vcmp.lt.s32.totalorder %v1254_v47, 3  ;;  %v1282_v14 = vsel %vm1276_vm14, %v1269_v45, 920167782  ;;  %v1285_v28 = vsel %vm1273_vm13, %v1263_v54, %v1266_v9 }
 0x1a4   : > { %vm1274_vm3 = vcmp.lt.s32.totalorder %v1254_v47, 2  ;;  %v1278_v50 = vsel %vm1276_vm14, %v1266_v9, 2102212464  ;;  %v1283_v57 = vsel %vm1275_vm15, %v1266_v9, %v1282_v14  ;;  %v1286_v19 = vsel %vm1276_vm14, %v1272_v15, 1326507024 }
 0x1a5   : > { %vm3082_vm4 = vcmp.lt.s32.totalorder %v3081_v1, 0  ;;  %v1257_v7 = vshrl.u32 %v3466_v40, %v1256_v56  ;;  %v1284_v21 = vsel %vm1274_vm3, %v1281_v33, %v1283_v57  ;;  %v1287_v42 = vsel %vm1275_vm15, %v1269_v45, %v1286_v19 }
 0x1a6   : > { %v1104_v13 = vsel %vm3082_vm4, 0, %v3081_v1  ;;  %v1288_v62 = vsel %vm1274_vm3, %v1285_v28, %v1287_v42  ;;  %v4292_v18 = vmul.u32.u64.low %v1289_v48, %v1284_v21  ;;  %v4293_v17 = vmul.u32.u64.high %v1289_v48, %v1284_v21, %v4292_v18 }
 0x1a7   : > { %vm1229_vm5 = vweird.f32 %v3650_v22  ;;  %v1105_v43 = vsub.s32 32, %v1104_v13  ;;  %v1109_v0 = vsub.s32 4294967266, %v1104_v13  ;;  %v1277_v23 = vsel %vm1273_vm13, %v1257_v7, %v1260_v52 }
 0x1a8   : > { %v1279_v49 = vsel %vm1275_vm15, %v1263_v54, %v1278_v50  ;;  %v905_v40 = vand.u32 2147483647, %v4211_v38  ;;  %vm2057_vm6 = vcmp.lt.s32.totalorder %v4261_v6, 2  ;;  %vm2058_vm7 = vcmp.eq.s32.totalorder %v4261_v6, 0 }
 0x1a9   : > { %v4301_v56 = vmul.u32.u64.low %v1289_v48, %v1288_v62  ;;  %v4302_v53 = vmul.u32.u64.high %v1289_v48, %v1288_v62, %v4301_v56  ;;  %v1106_v16 = vshll.u32 %v4263_v55, %v1104_v13  ;;  %v1107_v60 = vshrl.u32 %v1089_v5, %v1105_v43 }
 0x1aa   : > { %v1110_v44 = vadd.s32 127, %v1109_v0  ;;  %v3336_v59 = vpop.eup %3335  ;;  %vm1232_vm12 = vcmp.lt.s32.totalorder %v4278_v8, 2  ;;  %vm2061_vm2 = vcmp.eq.s32.totalorder %v4261_v6, 2  ;;  %v1280_v52 = vsel %vm1274_vm3, %v1277_v23, %v1279_v49 }
 0x1ab   : > { %v1299_v38 = vadd.s32 1, %v4293_v17  ;;  %v3338_v54 = vpop.eup %3337  ;;  %vm1233_vm8 = vcmp.eq.s32.totalorder %v4278_v8, 0  ;;  %v1237_v9 = vxor.u32 2147483648, %v3336_v59  ;;  %v1108_v45 = vor.u32 %v1107_v60, %v1106_v16  ;;  %v2689_v16 = vld [vmem:[%s4574_s5] sm:$0xff] }
 0x1ac   : > { %v1111_v46 = vshll.u32 %v1110_v44, 23  ;;  %v1234_v20 = vxor.u32 2147483648, %v3338_v54  ;;  %vm1236_vm9 = vcmp.eq.s32.totalorder %v4278_v8, 2  ;;  %v1119_v55 = vsub.s32 4, %v4243_v29 }
 0x1ad   : > { %vm1298_vm10 = vc.u32 %v4302_v53, %v4292_v18  ;;  %v1238_v35 = vsel %vm1236_vm9, %v1237_v9, %v3338_v54  ;;  %v2063_v5 = vsel %vm2061_vm2, %v1237_v9, %v3338_v54  ;;  %v1296_v15 = vmul.u32 %v1289_v48, %v1280_v52  ;;  %v2690_v9 = vld [vmem:[%s4574_s5 + $0x8] sm:$0xff] }
 0x1ae   : > { %v1112_v47 = vor.u32 4788187, %v1111_v46  ;;  %v1235_v33 = vsel %vm1233_vm8, %v3336_v59, %v1234_v20  ;;  %v2060_v1 = vsel %vm2058_vm7, %v3336_v59, %v1234_v20  ;;  %v1115_v14 = vcvt.s32.f32 %v1108_v45 }
 0x1af   : > { %v1300_v28 = vsel %vm1298_vm10, %v1299_v38, %v4293_v17  ;;  %v1239_v50 = vsel %vm1232_vm12, %v1235_v33, %v1238_v35  ;;  %v2064_v57 = vsel %vm2057_vm6, %v2060_v1, %v2063_v5  ;;  %v907_v21 = vcvt.s32.f32 %v4209_v26 }
 0x1b0   : > { %v1113_v19 = vand.u32 2147483647, %v1112_v47  ;;  %v1301_v7 = vadd.s32 %v1300_v28, %v1296_v15  ;;  %v4325_v48 = vsel %vm1229_vm5, nan, %v1239_v50  ;;  %v4329_v42 = vsel %vm1229_vm5, nan, %v2064_v57 }
 0x1b1   : > { %vm1035_vm11 = vcmp.lt.s32.totalorder %v3652_v25, 0  ;;  %v3164_v8 = vpack.c.bf16 %v4325_v48, %v4109_v27  ;;  %v3176_v6 = vpack.c.bf16 %v4329_v42, %v4195_v10  ;;  %v908_v17 = vmul.f32 %v907_v21, %v905_v40 }
 0x1b2   : > { %v1116_v13 = vmul.f32 %v1115_v14, %v1113_v19  ;;  %v1302_v62 = vadd.s32 536870912, %v1301_v7  ;;  %v1120_v26 = vsel %vm1035_vm11, %v1119_v55, %v4243_v29  ;;  %v710_v22 = vadd.s32 3, %v3995_v34 }
 0x1b3   : > { %vm1034_vm13 = vcmp.le.f32.partialorder %v1033_v63, 0.7853982  ;;  %v909_v60 = vxor.u32 2147483648, %v908_v17  ;;  %v3472_v44 = vmov 0   ;;  %vm827_vm14 = vcmp.lt.s32.totalorder %v3639_v12, 0 }
 0x1b4   : > { %v1117_v43 = vxor.u32 2147483648, %v1116_v13  ;;  %v4337_v0 = vshrl.u32 %v1302_v62, 30  ;;  %v1122_v49 = vsel %vm1034_vm13, 0, %v1120_v26  ;;  %3315 = vset.pattern.permute.xlu0 %v3472_v44  ;;  %3316 = vset.pattern.permute.xlu1 %v3472_v44  ;;  %v711_v59 = vand.u32 3, %v710_v22 }
 0x1b5   : > { %v1126_v63 = vadd.s32 3, %v1122_v49  ;;  %2693 = vperm.xlu0 %3315, %v2689_v16   ;;  %v714_v38 = vxor.u32 2147483648, %v4214_v51  ;;  %v717_v54 = vxor.u32 2147483648, %v4145_v32  ;;  %v1541_v45 = vand.u32 3, %v3995_v34 }
 0x1b6   : > { %v1118_v23 = vsel %vm1035_vm11, %v1117_v43, %v1116_v13  ;;  %v1304_v56 = vshll.u32 %v4337_v0, 30  ;;  %v910_v46 = vsel %vm827_vm14, %v909_v60, %v908_v17  ;;  %vm4361_vm15 = vcmp.le.f32.partialorder %v825_v24, 0.7853982 }
 0x1b7   : > { %v1121_v40 = vsel %vm1034_vm13, %v3652_v25, %v1118_v23  ;;  %v911_v35 = vsub.s32 4, %v3900_v41  ;;  %v1127_v5 = vand.u32 3, %v1126_v63  ;;  %vm713_vm3 = vcmp.eq.s32.totalorder %v711_v59, 0 }
 0x1b8   : > { %3339 = vcosq.f32 %v1121_v40  ;;  %v4347_v29 = vsub.s32 %v1301_v7, %v1304_v56  ;;  %vm716_vm4 = vcmp.eq.s32.totalorder %v711_v59, 2  ;;  %vm709_vm5 = vweird.f32 %v3637_v11 }
 0x1b9   : > { %3341 = vsinq.f32 %v1121_v40  ;;  %2698 = vperm.xlu0 %3315, %v2690_v9   ;;  %v913_v34 = vsel %vm4361_vm15, %v3639_v12, %v910_v46  ;;  %v715_v24 = vsel %vm713_vm3, %v4145_v32, %v714_v38  ;;  %v718_v15 = vsel %vm716_vm4, %v717_v54, %v4214_v51 }
 0x1ba   : > { %v1307_v52 = vsub.s32 0, %v4347_v29  ;;  %vm1125_vm6 = vweird.f32 %v3652_v25  ;;  %v1953_v33 = vand.u32 3, %v1122_v49  ;;  %vm712_vm7 = vcmp.lt.s32.totalorder %v711_v59, 2  ;;  %v4408_v25 = vld [vmem:[%s4572_s3] sm:$0xff] }
 0x1bb   : > { %vm1543_vm12 = vcmp.eq.s32.totalorder %v1541_v45, 0  ;;  %vm1546_vm2 = vcmp.eq.s32.totalorder %v1541_v45, 2  ;;  %vm2180_vm8 = vcmask 1046528   ;;  %v719_v50 = vsel %vm712_vm7, %v715_v24, %v718_v15 }
 0x1bc   : > { %v3088_v55 = vmin.u32 %v1307_v52, %v4347_v29  ;;  %v1545_v14 = vsel %vm1543_vm12, %v4145_v32, %v714_v38  ;;  %v1548_v28 = vsel %vm1546_vm2, %v717_v54, %v4214_v51  ;;  %vm1128_vm9 = vcmp.lt.s32.totalorder %v1127_v5, 2 }
 0x1bd   : > { %vm1129_vm10 = vcmp.eq.s32.totalorder %v1127_v5, 0  ;;  %v1297_v19 = vadd.s32 %v4292_v18, %v4302_v53  ;;  %vm1132_vm13 = vcmp.eq.s32.totalorder %v1127_v5, 2  ;;  %vm1542_vm3 = vcmp.lt.s32.totalorder %v1541_v45, 2  ;;  %v4423_v5 = vld [vmem:[%s4572_s3 + $0x8] sm:$0xff] }
 0x1be   : > { %v1309_v47 = vclz %v3088_v55  ;;  %v1549_v62 = vsel %vm1542_vm3, %v1545_v14, %v1548_v28  ;;  %vm1954_vm4 = vcmp.lt.s32.totalorder %v1953_v33, 2  ;;  %vm1958_vm12 = vcmp.eq.s32.totalorder %v1953_v33, 2 }
 0x1bf   : > { %vm1955_vm7 = vcmp.eq.s32.totalorder %v1953_v33, 0  ;;  %v720_v56 = vsel %vm709_vm5, nan, %v719_v50  ;;  %v1550_v60 = vsel %vm709_vm5, nan, %v1549_v62  ;;  %vm3473_vm2 = vmmov 1   ;;  %v4438_v33 = vld [vmem:[%s4571_s2] sm:$0xff] }
 0x1c0   : > { %v3089_v1 = vadd.s32 4294967294, %v1309_v47  ;;  %3343 = vcosq.f32 %v913_v34  ;;  %v912_v9 = vsel %vm827_vm14, %v911_v35, %v3900_v41  ;;  %vm2173_vm5 = vcmask 121856  }
 0x1c1   : > { %3345 = vsinq.f32 %v913_v34  ;;  %v1327_v41 = vsub.s32 4, %v4337_v0  ;;  %v914_v35 = vsel %vm4361_vm15, 0, %v912_v9  ;;  %vm1243_vm14 = vcmp.lt.s32.totalorder %v3654_v31, 0 }
 0x1c2   : > { %v3340_v57 = vpop.eup %3339  ;;  %vm3090_vm11 = vcmp.lt.s32.totalorder %v3089_v1, 0  ;;  %vm1242_vm15 = vcmp.le.f32.partialorder %v1241_v30, 0.7853982  ;;  %v1747_v28 = vand.u32 3, %v914_v35 }
 0x1c3   : > { %v3342_v7 = vpop.eup %3341  ;;  %v1312_v21 = vsel %vm3090_vm11, 0, %v3089_v1  ;;  %v1133_v13 = vxor.u32 2147483648, %v3340_v57  ;;  %vm4389_vm11 = vmpackc.low %vm2180_vm8, %vm3473_vm2  ;;  %v1328_v34 = vsel %vm1243_vm14, %v1327_v41, %v4337_v0  ;;  %v2717_v41 = vld [vmem:[%s4575_s6] sm:$0xff] }
 0x1c4   : > { %v1313_v17 = vsub.s32 32, %v1312_v21  ;;  %v1317_v26 = vsub.s32 4294967266, %v1312_v21  ;;  %v1130_v32 = vxor.u32 2147483648, %v3342_v7  ;;  %v1314_v51 = vshll.u32 %v4347_v29, %v1312_v21 }
 0x1c5   : > { %v1134_v43 = vsel %vm1132_vm13, %v1133_v13, %v3342_v7  ;;  %v1960_v22 = vsel %vm1958_vm12, %v1133_v13, %v3342_v7  ;;  %v1330_v1 = vsel %vm1242_vm15, 0, %v1328_v34  ;;  %vm1748_vm3 = vcmp.lt.s32.totalorder %v1747_v28, 2 }
 0x1c6   : > { %v1315_v23 = vshrl.u32 %v1297_v19, %v1313_v17  ;;  %v1318_v49 = vadd.s32 127, %v1317_v26  ;;  %v1131_v18 = vsel %vm1129_vm10, %v3340_v57, %v1130_v32  ;;  %v1957_v53 = vsel %vm1955_vm7, %v3340_v57, %v1130_v32  ;;  %v2170_v57 = vld [vmem:[%s4571_s2 + $0x8] sm:$0xff] }
 0x1c7   : > { %v1135_v16 = vsel %vm1128_vm9, %v1131_v18, %v1134_v43  ;;  %v1961_v40 = vsel %vm1954_vm4, %v1957_v53, %v1960_v22  ;;  %v1334_v50 = vadd.s32 3, %v1330_v1  ;;  %v2159_v13 = vand.u32 3, %v1330_v1  ;;  %v2508_v22 = vld [vmem:[%s4573_s4 + $0x8] sm:$0xff] }
 0x1c8   : > { %v1316_v44 = vor.u32 %v1315_v23, %v1314_v51  ;;  %v1319_v29 = vshll.u32 %v1318_v49, 23  ;;  %v1136_v59 = vsel %vm1125_vm6, nan, %v1135_v16  ;;  %v1962_v52 = vsel %vm1125_vm6, nan, %v1961_v40 }
 0x1c9   : > { %v3155_v38 = vpack.c.bf16 %v1136_v59, %v720_v56  ;;  %v3167_v11 = vpack.c.bf16 %v1962_v52, %v1550_v60  ;;  %v1335_v21 = vand.u32 3, %v1334_v50  ;;  %vm1749_vm9 = vcmp.eq.s32.totalorder %v1747_v28, 0 }
 0x1ca   : > { %v1320_v54 = vor.u32 4788187, %v1319_v29  ;;  %v1323_v46 = vcvt.s32.f32 %v1316_v44  ;;  %v3344_v47 = vpop.eup %3343  ;;  %vm1752_vm10 = vcmp.eq.s32.totalorder %v1747_v28, 2  ;;  %vm2164_vm12 = vcmp.eq.s32.totalorder %v2159_v13, 2 }
 0x1cb   : > { %3157 = vmatprep.subr.msk.bf16.mxu0 %vm4389_vm11, %v3155_v38  ;;  %v3346_v15 = vpop.eup %3345  ;;  %v925_v0 = vxor.u32 2147483648, %v3344_v47  ;;  %vm1340_vm4 = vcmp.eq.s32.totalorder %v1335_v21, 2  ;;  %vm1337_vm7 = vcmp.eq.s32.totalorder %v1335_v21, 0  ;;  %vm2161_vm2 = vcmp.eq.s32.totalorder %v2159_v13, 0 }
 0x1cc   : > { %v1321_v45 = vand.u32 2147483647, %v1320_v54  ;;  %3160 = vmatpush1.bf16.msk.msra.mxu0 %vm4389_vm11, %v3158_v39  ;;  %v4598_v39 = vmov 0.0   ;;  %v922_v14 = vxor.u32 2147483648, %v3346_v15 }
 0x1cd   : > { %3131 = vmatprep.subr.msk.mxu0 %vm350_vm0, %v3607_v3  ;;  %v918_v3 = vadd.s32 3, %v914_v35 }
 0x1ce   : > { %v1324_v55 = vmul.f32 %v1323_v46, %v1321_v45  ;;  %v1751_v58 = vsel %vm1749_vm9, %v3344_v47, %v922_v14 }
 0x1cf   : > { %3125 = vmatmul.mubr.msk.f32.vlgmr.msra.gmra.mrb[4].mxu0 %vm2173_vm5, %v4408_v25  ;;  %v919_v30 = vand.u32 3, %v918_v3 }
 0x1d0   : > { %v1325_v36 = vxor.u32 2147483648, %v1324_v55  ;;  %3132 = vmatpush1.msk.msra.mxu0 %vm350_vm0, %v3367_v37  ;;  %2263 = vmatprep.mubr.f32.mxu0 %v4598_v39 }
 0x1d1   : > { %3169 = vmatprep.subr.msk.bf16.mxu0 %vm4389_vm11, %v3167_v11  ;;  %vm921_vm6 = vcmp.eq.s32.totalorder %v919_v30, 0  ;;  %vm924_vm8 = vcmp.eq.s32.totalorder %v919_v30, 2  ;;  %vm920_vm13 = vcmp.lt.s32.totalorder %v919_v30, 2 }
 0x1d2   : > { %v1326_v20 = vsel %vm1243_vm14, %v1325_v36, %v1324_v55  ;;  %v923_v19 = vsel %vm921_vm6, %v3344_v47, %v922_v14  ;;  %v926_v7 = vsel %vm924_vm8, %v925_v0, %v3346_v15  ;;  %vm1336_vm14 = vcmp.lt.s32.totalorder %v1335_v21, 2 }
 0x1d3   : > { %v1329_v24 = vsel %vm1242_vm15, %v3654_v31, %v1326_v20  ;;  %3126 = vmatmul.mubr.msk.f32.gmra.mrb[6].mxu0 %vm2173_vm5, %v4423_v5  ;;  %v927_v26 = vsel %vm920_vm13, %v923_v19, %v926_v7  ;;  %vm2160_vm15 = vcmp.lt.s32.totalorder %v2159_v13, 2  ;;  %vm917_vm6 = vweird.f32 %v3639_v12  ;;  %v3368_v12 = vld [vmem:[%s3603_s22 + $0x8] sm:$0x77]  ;;  %s2963_s22 = sshll.u32 %s323_s17, 4  ;;  %s4516_s22 = int_to_ptr.vmem [resolvable:$true] %s2963_s22 }
 0x1d4   : > { %3347 = vcosq.f32 %v1329_v24  ;;  %2417 = vmatprep.mubr.f32.mxu0 %v4598_v39  ;;  %vm1333_vm8 = vweird.f32 %v3654_v31  ;;  %v928_v60 = vsel %vm917_vm6, nan, %v927_v26  ;;  %s3369_s24 = scalar_lea.vmem %s4516_s22, 512  ;;  %p3376_p4 = scmp.lt.s32.totalorder %s4516_s22, %s3374_s20 }
 0x1d5   : > { %3349 = vsinq.f32 %v1329_v24  ;;  %p3370_p0 = scmp.ne.s32.totalorder %s4516_s22, %s3369_s24  ;;  %p3377_p5 = scmp.lt.s32.totalorder %s3375_s21, %s3369_s24 }
 0x1d7   : > { %3133 = vmatmul.mubr.msk.f32.vlgmr.msra.gmra.mrb[4].mxu0 %vm343_vm1, %v4438_v33  ;;  %p3371_p1 = pnand %p3370_p0, %p3571_p3  ;;  %p3378_p6 = por %p3377_p5, %p3376_p4 }
 0x1d8   : > { %3172 = vmatpush1.bf16.msk.msra.mxu0 %vm4389_vm11, %v3170_v61  ;;  %2423 = vmatprep.mubr.f32.mxu0 %v4598_v39  ;;  %v1754_v61 = vsel %vm1752_vm10, %v925_v0, %v3346_v15 }
 0x1d9   : > { %v1755_v43 = vsel %vm1748_vm3, %v1751_v58, %v1754_v61  ;;  %p3372_p2 = pneg %p3371_p1 }
 0x1da   : > { %v1756_v44 = vsel %vm917_vm6, nan, %v1755_v43 }
 0x1db   : > { %3134 = vmatmul.mubr.msk.f32.gmra.mrb[6].mxu0 %vm343_vm1, %v2170_v57  ;;  %p3379_p7 = pnand %p3378_p6, %p3372_p2 }
 0x1dc   : > { %2591 = vmatprep.mubr.f32.mxu0 %v4598_v39 }
 0x1de   : > { %v3348_v62 = vpop.eup %3347 }
 0x1df   : > { %v3350_v17 = vpop.eup %3349  ;;  %v1341_v32 = vxor.u32 2147483648, %v3348_v62  ;;  %3141 = vmatmul.mubr.msk.f32.vlgmr.msra.gmra.mrb[4].mxu0 %vm2173_vm5, %v2507_v2 }
 0x1e0   : > { %v1338_v51 = vxor.u32 2147483648, %v3350_v17  ;;  %2597 = vmatprep.mubr.f32.mxu0 %v4598_v39 }
 0x1e1   : > { %v1342_v23 = vsel %vm1340_vm4, %v1341_v32, %v3350_v17  ;;  %v2166_v49 = vsel %vm2164_vm12, %v1341_v32, %v3350_v17 }
 0x1e2   : > { %v1339_v18 = vsel %vm1337_vm7, %v3348_v62, %v1338_v51  ;;  %v2163_v53 = vsel %vm2161_vm2, %v3348_v62, %v1338_v51 }
 0x1e3   : > { %v1343_v56 = vsel %vm1336_vm14, %v1339_v18, %v1342_v23  ;;  %v2167_v16 = vsel %vm2160_vm15, %v2163_v53, %v2166_v49  ;;  %3142 = vmatmul.mubr.msk.f32.gmra.mrb[6].mxu0 %vm2173_vm5, %v2508_v22 }
 0x1e4   : > { %v1344_v40 = vsel %vm1333_vm8, nan, %v1343_v56  ;;  %v2168_v29 = vsel %vm1333_vm8, nan, %v2167_v16  ;;  %2792 = vmatprep.mubr.f32.mxu0 %v4598_v39 }
 0x1e5   : > { %v3161_v59 = vpack.c.bf16 %v1344_v40, %v928_v60  ;;  %v3173_v52 = vpack.c.bf16 %v2168_v29, %v1756_v44 }
 0x1e7   : > { %3163 = vmatprep.subr.msk.bf16.mxu1 %vm4389_vm11, %v3161_v59 }
 0x1e8   : > { %3166 = vmatpush1.bf16.msk.msra.mxu1 %vm4389_vm11, %v3164_v8 }
 0x1e9   : > { %3135 = vmatprep.subr.msk.mxu1 %vm350_vm0, %v3609_v4  ;;  %v2718_v4 = vld [vmem:[%s4576_s7] sm:$0xff] }
 0x1ea   : > { %2721 = vperm.xlu1 %3316, %v2718_v4  }
 0x1eb   : > { %3129 = vmatmul.mubr.msk.f32.vlgmr.msra.gmra.mrb[4].mxu1 %vm2173_vm5, %v4408_v25 }
 0x1ec   : > { %3136 = vmatpush1.msk.msra.mxu1 %vm350_vm0, %v3368_v12  ;;  %2340 = vmatprep.mubr.f32.mxu1 %v4598_v39  ;;  %vm2724_vm0 = vcmask 130048  }
 0x1ed   : > { %3175 = vmatprep.subr.msk.bf16.mxu1 %vm4389_vm11, %v3173_v52 }
 0x1ef   : > { %3130 = vmatmul.mubr.msk.f32.gmra.mrb[6].mxu1 %vm2173_vm5, %v4423_v5 }
 0x1f0   : > { %2494 = vmatprep.mubr.f32.mxu1 %v4598_v39 }
 0x1f3   : > { %3137 = vmatmul.mubr.msk.f32.vlgmr.msra.gmra.mrb[4].mxu1 %vm343_vm1, %v4438_v33 }
 0x1f4   : > { %3178 = vmatpush1.bf16.msk.msra.mxu1 %vm4389_vm11, %v3176_v6  ;;  %2500 = vmatprep.mubr.f32.mxu1 %v4598_v39 }
 0x1f7   : > { %3138 = vmatmul.mubr.msk.f32.gmra.mrb[6].mxu1 %vm343_vm1, %v2170_v57 }
 0x1f8   : > { %2668 = vmatprep.mubr.f32.mxu1 %v4598_v39 }
 0x1fb   : > { %3145 = vmatmul.mubr.msk.f32.vlgmr.msra.gmra.mrb[4].mxu1 %vm2173_vm5, %v2507_v2 }
 0x1fc   : > { %2674 = vmatprep.mubr.f32.mxu1 %v4598_v39 }
 0x1ff   : > { %3146 = vmatmul.mubr.msk.f32.gmra.mrb[6].mxu1 %vm2173_vm5, %v2508_v22 }
 0x200   : > { %2863 = vmatprep.mubr.f32.mxu1 %v4598_v39 }
 0x234   : > { %v2694_v31 = vpop.permute.xlu0 %2693 }
 0x238   : > { %v2699_v42 = vpop.permute.xlu0 %2698 }
 0x269   : > { %v2722_v14 = vpop.permute.xlu1 %2721 }
 0x2b2   : > { %v2593_v27 = vpop.f32.mrb[4].mxu0 }
 0x2b3   : > { %v2595_v10 = vpop.f32.mrb[5].mxu0  ;;  %v2701_v48 = vadd.f32 %v2694_v31, %v2593_v27 }
 0x2b4   : > { %v2702_v8 = vadd.f32 %v2694_v31, %v2595_v10 }
 0x2b5   : > { %v2709_v54 = vmax.f32 %v2701_v48, 0.0 }
 0x2b6   : > { %v2599_v6 = vpop.f32.mrb[6].mxu0  ;;  %v2710_v45 = vmax.f32 %v2702_v8, 0.0 }
 0x2b7   : > { %v2705_v63 = vadd.f32 %v2699_v42, %v2599_v6  ;;  %v2601_v38 = vpop.f32.mrb[7].mxu0 }
 0x2b8   : > { %v2706_v11 = vadd.f32 %v2699_v42, %v2601_v38 }
 0x2b9   : > { %v2713_v9 = vmax.f32 %v2705_v63, 0.0 }
 0x2ba   : > { %v2714_v46 = vmax.f32 %v2706_v11, 0.0 }
 0x2bb   : > { %v3181_v25 = vpack.c.bf16 %v2713_v9, %v2709_v54 }
 0x2bc   : > { %v3179_v55 = vpack.c.bf16 %v2714_v46, %v2710_v45 }
 0x2be   : > { %3180 = vmatprep.subr.bf16.mxu0 %v3179_v55 }
 0x2bf   : > { %3182 = vmatpush1.bf16.msra.mxu0 %v3181_v25 }
 0x2c2   : > { %3147 = vmatmul.mubr.msk.f32.vlgmr.msra.gmra.mrb[8].mxu0 %vm2724_vm0, %v2717_v41 }
 0x2ce   : > { %v2670_v35 = vpop.f32.mrb[4].mxu1 }
 0x2cf   : > { %v2672_v36 = vpop.f32.mrb[5].mxu1  ;;  %v2703_v37 = vadd.f32 %v2694_v31, %v2670_v35 }
 0x2d0   : > { %v2704_v39 = vadd.f32 %v2694_v31, %v2672_v36 }
 0x2d1   : > { %v2711_v47 = vmax.f32 %v2703_v37, 0.0 }
 0x2d2   : > { %v2676_v5 = vpop.f32.mrb[6].mxu1  ;;  %v2712_v15 = vmax.f32 %v2704_v39, 0.0 }
 0x2d3   : > { %v2707_v3 = vadd.f32 %v2699_v42, %v2676_v5  ;;  %v2678_v20 = vpop.f32.mrb[7].mxu1 }
 0x2d4   : > { %v2708_v34 = vadd.f32 %v2699_v42, %v2678_v20 }
 0x2d5   : > { %v2715_v24 = vmax.f32 %v2707_v3, 0.0 }
 0x2d6   : > { %v2716_v33 = vmax.f32 %v2708_v34, 0.0 }
 0x2d7   : > { %v3185_v1 = vpack.c.bf16 %v2715_v24, %v2711_v47 }
 0x2d8   : > { %v3183_v30 = vpack.c.bf16 %v2716_v33, %v2712_v15 }
 0x2da   : > { %3184 = vmatprep.subr.bf16.mxu1 %v3183_v30 }
 0x2db   : > { %3186 = vmatpush1.bf16.msra.mxu1 %v3185_v1 }
 0x2de   : > { %3148 = vmatmul.mubr.msk.f32.vlgmr.msra.gmra.mrb[8].mxu1 %vm2724_vm0, %v2717_v41 }
 0x395   : > { %v2794_v0 = vpop.f32.mrb[8].mxu0 }
 0x396   : > { %v2795_v28 = vadd.f32 %v2794_v0, %v2722_v14  ;;  %v2796_v50 = vpop.f32.mrb[9].mxu0 }
 0x397   : > { %v2797_v57 = vadd.f32 %v2796_v50, %v2722_v14 }
 0x398   : > { %v2870_v19 = vrot.slane %v2795_v28, 4 }
 0x399   : > { %v2876_v7 = vrot.slane %v2797_v57, 4 }
 0x39a   : > { %v2871_v21 = vmax.f32 %v2795_v28, %v2870_v19 }
 0x39b   : > { %v2877_v13 = vmax.f32 %v2797_v57, %v2876_v7 }
 0x39c   : > { %v2872_v2 = vrot.slane %v2871_v21, 2 }
 0x39d   : > { %v2878_v58 = vrot.slane %v2877_v13, 2 }
 0x39e   : > { %v2873_v61 = vmax.f32 %v2871_v21, %v2872_v2 }
 0x39f   : > { %v2879_v62 = vmax.f32 %v2877_v13, %v2878_v58 }
 0x3a0   : > { %v2874_v17 = vrot.slane %v2873_v61, 1 }
 0x3a1   : > { %v2880_v26 = vrot.slane %v2879_v62, 1 }
 0x3a2   : > { %v2875_v32 = vmax.f32 %v2873_v61, %v2874_v17 }
 0x3a3   : > { %v2881_v51 = vmax.f32 %v2879_v62, %v2880_v26 }
 0x3a4   : > { %v2894_v43 = vsub.f32 %v2795_v28, %v2875_v32 }
 0x3a5   : > { %v2895_v22 = vsub.f32 %v2797_v57, %v2881_v51 }
 0x3a6   : > { %v2898_v23 = vmul.f32 1.442695, %v2894_v43 }
 0x3a7   : > { %v2900_v49 = vmul.f32 1.442695, %v2895_v22 }
 0x3a8   : > { %3351 = vpow2.f32 %v2898_v23 }
 0x3a9   : > { %3353 = vpow2.f32 %v2900_v49 }
 0x3b1   : > { %v2865_v18 = vpop.f32.mrb[8].mxu1 }
 0x3b2   : > { %v3352_v53 = vpop.eup %3351  ;;  %v2866_v56 = vadd.f32 %v2865_v18, %v2722_v14  ;;  %v2867_v16 = vpop.f32.mrb[9].mxu1 }
 0x3b3   : > { %v3354_v60 = vpop.eup %3353  ;;  %v2906_v40 = vrot.slane %v3352_v53, 4  ;;  %v2868_v44 = vadd.f32 %v2867_v16, %v2722_v14 }
 0x3b4   : > { %v2882_v29 = vrot.slane %v2866_v56, 4  ;;  %v2912_v59 = vrot.slane %v3354_v60, 4 }
 0x3b5   : > { %v2888_v52 = vrot.slane %v2868_v44, 4  ;;  %v2907_v12 = vadd.f32 %v3352_v53, %v2906_v40 }
 0x3b6   : > { %v2883_v4 = vmax.f32 %v2866_v56, %v2882_v29  ;;  %v2913_v31 = vadd.f32 %v3354_v60, %v2912_v59 }
 0x3b7   : > { %v2889_v27 = vmax.f32 %v2868_v44, %v2888_v52  ;;  %v2908_v10 = vrot.slane %v2907_v12, 2 }
 0x3b8   : > { %v2884_v48 = vrot.slane %v2883_v4, 2  ;;  %v2914_v42 = vrot.slane %v2913_v31, 2 }
 0x3b9   : > { %v2890_v8 = vrot.slane %v2889_v27, 2  ;;  %v2909_v6 = vadd.f32 %v2908_v10, %v2907_v12 }
 0x3ba   : > { %v2885_v63 = vmax.f32 %v2883_v4, %v2884_v48  ;;  %v2915_v38 = vadd.f32 %v2914_v42, %v2913_v31 }
 0x3bb   : > { %v2891_v11 = vmax.f32 %v2889_v27, %v2890_v8  ;;  %v2910_v54 = vrot.slane %v2909_v6, 1 }
 0x3bc   : > { %v2886_v9 = vrot.slane %v2885_v63, 1  ;;  %v2916_v45 = vrot.slane %v2915_v38, 1 }
 0x3bd   : > { %v2892_v46 = vrot.slane %v2891_v11, 1  ;;  %v2911_v25 = vadd.f32 %v2910_v54, %v2909_v6 }
 0x3be   : > { %v2887_v55 = vmax.f32 %v2885_v63, %v2886_v9  ;;  %v2917_v41 = vadd.f32 %v2916_v45, %v2915_v38 }
 0x3bf   : > { %v2893_v35 = vmax.f32 %v2891_v11, %v2892_v46  ;;  %3355 = vrcp.f32 %v2911_v25 }
 0x3c0   : > { %v2896_v36 = vsub.f32 %v2866_v56, %v2887_v55  ;;  %3357 = vrcp.f32 %v2917_v41 }
 0x3c1   : > { %v2897_v37 = vsub.f32 %v2868_v44, %v2893_v35 }
 0x3c2   : > { %v2902_v39 = vmul.f32 1.442695, %v2896_v36 }
 0x3c3   : > { %v2904_v5 = vmul.f32 1.442695, %v2897_v37 }
 0x3c4   : > { %3359 = vpow2.f32 %v2902_v39 }
 0x3c5   : > { %3361 = vpow2.f32 %v2904_v5 }
 0x3c9   : > { %v3356_v3 = vpop.eup %3355 }
 0x3ca   : > { %v3358_v20 = vpop.eup %3357  ;;  %v2934_v34 = vmul.f32 %v3356_v3, %v3352_v53 }
 0x3cb   : > { %v2935_v47 = vmul.f32 %v3358_v20, %v3354_v60 }
 0x3cc   : > { %2942 = vst [vmem:[%s323_s17] sm:$0xff] %v2934_v34 }
 0x3cd   : > { %2943 = vst [vmem:[%s323_s17 + $0x8] sm:$0xff] %v2935_v47 }
 0x3ce   : > { %v3360_v24 = vpop.eup %3359 }
 0x3cf   : > { %v3362_v15 = vpop.eup %3361  ;;  %v2918_v33 = vrot.slane %v3360_v24, 4 }
 0x3d0   : > { %v2924_v1 = vrot.slane %v3362_v15, 4 }
 0x3d1   : > { %v2919_v30 = vadd.f32 %v3360_v24, %v2918_v33 }
 0x3d2   : > { %v2925_v14 = vadd.f32 %v3362_v15, %v2924_v1 }
 0x3d3   : > { %v2920_v0 = vrot.slane %v2919_v30, 2 }
 0x3d4   : > { %v2926_v28 = vrot.slane %v2925_v14, 2 }
 0x3d5   : > { %v2921_v50 = vadd.f32 %v2920_v0, %v2919_v30 }
 0x3d6   : > { %v2927_v57 = vadd.f32 %v2926_v28, %v2925_v14 }
 0x3d7   : > { %v2922_v19 = vrot.slane %v2921_v50, 1 }
 0x3d8   : > { %v2928_v7 = vrot.slane %v2927_v57, 1 }
 0x3d9   : > { %v2923_v21 = vadd.f32 %v2922_v19, %v2921_v50 }
 0x3da   : > { %v2929_v13 = vadd.f32 %v2928_v7, %v2927_v57 }
 0x3db   : > { %3363 = vrcp.f32 %v2923_v21 }
 0x3dc   : > { %3365 = vrcp.f32 %v2929_v13 }
 0x3e5   : > { %v3364_v2 = vpop.eup %3363 }
 0x3e6   : > { %v3366_v58 = vpop.eup %3365  ;;  %v2936_v61 = vmul.f32 %v3364_v2, %v3360_v24 }
 0x3e7   : > { %v2937_v62 = vmul.f32 %v3366_v58, %v3362_v15 }
 0x3e8   : > { %2944 = vst [vmem:[%s323_s17 + $0x10] sm:$0xff] %v2936_v61 }
 0x3e9   : > { %2945 = vst [vmem:[%s323_s17 + $0x18] sm:$0xff] %v2937_v62 }
 0x3ea   : > { %3382 = shalt.err (!%p3379_p7)
}
 0x3eb   : > { %s3383_s13 = scalar_lea.hbm %s4514_s26, 512  ;;  %s3387_s16 = scalar_lea.hbm %s4577_s8, 2048 }
 0x3ec   : > { %p3384_p9 = scmp.ne.s32.totalorder %s4514_s26, %s3383_s13  ;;  %p3388_p12 = scmp.lt.u32.totalorder %s4514_s26, %s4577_s8 }
 0x3ed   : > { %p3389_p13 = scmp.lt.u32.totalorder %s3387_s16, %s3383_s13  ;;  %p3391_p1 = scmp.lt.u32.totalorder %s3383_s13, %s4514_s26 }
 0x3ee   : > { %p3385_p10 = pnand %p3384_p9, %p3571_p3 }
 0x3ef   : > { %p3390_p0 = por %p3389_p13, %p3388_p12 }
 0x3f0   : > { %p3386_p11 = pneg %p3385_p10 }
 0x3f1   : > { %p3392_p2 = por %p3391_p1, %p3390_p0 }
 0x3f3   : > { %p3393_p4 = pnand %p3392_p2, %p3386_p11 }
 0x3f5   : > { %3396 = shalt.err (!%p3393_p4)
}
 0x3f6   : > { %3235 = dma.vmem_to_hbm [thread:$0]  (%p3571_p3), %s4516_s22, 512, %s4514_s26, %s2947_s9  }
 0x3f7 PF: > { %p3241_p5 = scmp.ge.s32.totalorder %s3463_s12, 2  ;;  %s2975_s24 = sand.u32 1, %s3435_s27  }
 0x3f8   : > { %s2976_s20 = scalar_lea.sflag [#allocation3], %s2975_s24 }
 0x3f9   : > { %p3238_p6 = pnand %p3241_p5, %p3580_p8 }
 0x3fb   : > { %3430 = dma.done.wait (!%p3238_p6), %s2976_s20, 512  }
 0x3fc   : > { %3432 = vsyncadd (!%p3238_p6), %s2976_s20, 4294966784  ;;  %s21_s12 = sadd.s32 1, %s3463_s12   ;;  %s4599_s18 = sld [smem:[#allocation5_spill]] }
 0x3fd   : > { %p18_p7 = scmp.ge.s32.totalorder %s21_s12, 6   ;;  %s4600_s27 = smov %s3439_s28 }
 0x3fe   : > { %s4601_s28 = smov %s3443_s29  ;;  %s4602_s29 = smov %s3589_s23 }
 0x3ff   : > { %s4603_s30 = smov %s3455_s10  ;;  %s4604_s9 = smov %s3459_s11 }
 0x400   : > { %s4605_s10 = smov %s4608_s15  ;;  %20 = sbr.rel (!%p18_p7) target bundleno = 5 (0x5), region = 87 }
 0x402   : > { %s4606_s11 = smov %s4599_s18 }
 0x407   :  { %2981 = vsyncpa [#allocation3], 1 }
 0x408   :  { %2983 = vsyncpa [#allocation3 + $0x1], 1 }

</bundles_post_ra>
